<compile_context>
chip_gen: v5e
topology: v5e:2x2
jax: 0.10.0
libtpu: 0.0.40
codegen_flags: <defaults>
</compile_context>

<pallas_src>
import functools

import jax
import jax.numpy as jnp
import numpy as np
from jax.experimental import pallas as pl
from jax.experimental.pallas import tpu as pltpu


def _clog(x):
    # PyTorch BCELoss clamps log at -100.
    return jnp.maximum(jnp.log(x), -100.0)


def _event_loss_kernel(
    es_ref, s_ref, y_col_ref, e_col_ref, pred_col_ref, valid_col_ref,   # (TM, *) row tiles
    lhs_ref,                                                            # (8, TM) bf16 lhs rows
    y_row_ref, e_row_ref, pred_row_ref,                                 # (1, TN) column tiles
    rpe_ref, sume_ref, semask_ref,                                      # (1, 1) wrapper scalars
    o_ref,                                                              # (1, 1) output
    acc_ref, bce2_ref, bce4_ref, cnum_ref, cden_ref, logle_ref,         # scratch
    *, alpha, beta, gamma, n_valid, t_len,
):
    f32 = jnp.float32
    i = pl.program_id(0)          # row-tile index (outer)
    j = pl.program_id(1)          # column-tile index (inner)
    ni = pl.num_programs(0)
    nj = pl.num_programs(1)
    TN = y_row_ref.shape[1]

    @pl.when((i == 0) & (j == 0))
    def _init_scalars():
        bce2_ref[...] = jnp.zeros_like(bce2_ref)
        bce4_ref[...] = jnp.zeros_like(bce4_ref)
        cnum_ref[...] = jnp.zeros_like(cnum_ref)
        cden_ref[...] = jnp.zeros_like(cden_ref)
        logle_ref[...] = jnp.zeros_like(logle_ref)

    @pl.when(i == 0)
    def _init_acc():
        acc_ref[j] = jnp.zeros((8, TN), f32)

    y_c = y_col_ref[...]        # (TM, 1) survival time
    e_c = e_col_ref[...]        # (TM, 1) event indicator
    p_c = pred_col_ref[...]     # (TM, 1) -risk_time score
    v_c = valid_col_ref[...]    # (TM, 1) 1 for real rows, 0 for padding
    y_r = y_row_ref[...]        # (1, TN)
    e_r = e_row_ref[...]        # (1, TN)
    p_r = pred_row_ref[...]     # (1, TN)

    def ssum(x):                # full reduce -> (1, 1)
        return jnp.sum(x).reshape(1, 1)

    # ---- once per row tile (j == 0): BCE(event_seq, s) and survival BCE on (TM, T) ------
    @pl.when(j == 0)
    def _row_phase():
        es = es_ref[...]                                             # (TM, T) hazards
        s = s_ref[...]                                               # (TM, T) one-hot target
        col_t = jax.lax.broadcasted_iota(jnp.int32, es.shape, 1).astype(f32)
        tte = jnp.sum(s * col_t, axis=1, keepdims=True)              # == argmax(s, 1)
        es_g = jnp.sum(es * s, axis=1, keepdims=True)                # event_seq[i, tte_i]
        log1m = _clog(1.0 - es)                                      # one log per element
        log1m_sum = jnp.sum(log1m, axis=1, keepdims=True)
        log1m_g = jnp.sum(s * log1m, axis=1, keepdims=True)          # clog(1 - es_g)
        # per-row BCE sum = -(clog(es_g) + sum_t clog(1-es_t) - clog(1-es_g))
        row_b2 = log1m_g - log1m_sum - _clog(es_g)
        bce2_ref[...] += ssum(v_c * row_b2)

        # log prod_{t < tte}(1 - es_t) via masked clamped-log sum (final clamp kept).
        mask = (col_t < tte).astype(f32)
        log_surv = jnp.sum(mask * log1m, axis=1, keepdims=True)
        surv = jnp.exp(log_surv)
        c = 1.0 - e_c
        row_b4 = -(c * jnp.maximum(log_surv, -100.0) + (1.0 - c) * _clog(1.0 - surv))
        bce4_ref[...] += ssum(v_c * row_b4)

    # ---- pairwise (TM, TN) phase ---------------------------------------------------------
    le = y_r <= y_c                                   # [y_b <= y_a], bool (TM, TN)
    mask2 = le.astype(jnp.bfloat16)                   # exact 0/1 in bf16
    # lhs rows: [exp_hi, exp_lo, valid, e-mask, 0...]; single-pass bf16 MXU matmul.
    contrib = jnp.dot(lhs_ref[...], mask2, preferred_element_type=jnp.float32)  # (8, TN)
    acc_j = acc_ref[j] + contrib
    acc_ref[j] = acc_j

    # Concordance numerator: sum_{a,b} emask[a] * [y_a < y_b] * credit(a, b),
    # credit = 0.5 * ([p_a < p_b] + [p_a <= p_b]); e-mask hoisted to an O(TM) multiply.
    cr = (p_c < p_r).astype(f32) + (p_c <= p_r).astype(f32)          # 2 * credit
    row_cr = jnp.sum(jnp.where(le, 0.0, cr), axis=1, keepdims=True)  # (TM, 1)
    emask_c = (e_c > 0.5).astype(f32) * v_c
    cnum_ref[...] += ssum(emask_c * row_cr) * 0.5

    # ---- this column block is final once the last row tile has been accumulated ---------
    @pl.when(i == ni - 1)
    def _col_final():
        num = acc_j[0:1, :] + acc_j[1:2, :]           # Cox numerator (hi + lo rows)
        den = acc_j[2:3, :]                           # Cox denominator (valid-row counts)
        loge = jnp.where(e_r > 0.0, jnp.log(num / den), 0.0)   # padded cols masked (e=0)
        logle_ref[...] += ssum(loge * e_r)
        cden_ref[...] += ssum(acc_j[3:4, :])          # sum_b sum_a emask[a]*[y_b <= y_a]

    # ---- global finalize -----------------------------------------------------------------
    @pl.when((i == ni - 1) & (j == nj - 1))
    def _finalize():
        rpe = rpe_ref[...]                            # sum(risk_pred * e)
        sum_e = sume_ref[...]                         # sum(e)
        sum_emask = semask_ref[...]                   # #(e > 0.5)
        loss1 = -(rpe - logle_ref[...]) / sum_e
        loss2 = bce2_ref[...] / (n_valid * t_len)
        ccnt = n_valid * sum_emask - cden_ref[...]    # comparable-pair count
        loss3 = 1.0 - cnum_ref[...] / ccnt
        loss4 = bce4_ref[...] / n_valid
        o_ref[...] = loss1 + alpha * loss2 + beta * loss3 + gamma * loss4


def _round_up(x, m):
    return (x + m - 1) // m * m


def _pick_tile(n_padded, candidates):
    for t in candidates:
        if n_padded % t == 0:
            return t
    return 128


def event_loss(risk_pred, event_seq, y, e, s, *, alpha, beta, gamma,
               row_tile=None, col_tile=None):
    N, T = event_seq.shape
    assert risk_pred.shape == (N, 1) and y.shape == (N, 1) and e.shape == (N, 1)
    assert s.shape == (N, T)
    f32 = jnp.float32
    risk_pred = risk_pred.astype(f32)
    event_seq = event_seq.astype(f32)
    y = y.astype(f32)
    e = e.astype(f32)
    s = s.astype(f32)   # NOTE: s must be exactly one-hot along T (model contract).

    # risk_time score: pred = -(e * event_seq[i, argmax(s_i)]).  Computed ONCE so the row
    # and column views used by the exact-tie test are bit-identical.
    tte = jnp.argmax(s, axis=1)
    gathered = jnp.take_along_axis(event_seq, tte[:, None], axis=1)   # (N, 1)
    pred = -(e * gathered)

    # O(N) scalar reductions done in plain JAX (removes per-step lane-tile DMA / reduces).
    rpe_s = jnp.sum(risk_pred * e).reshape(1, 1)
    sume_s = jnp.sum(e).reshape(1, 1)
    semask_s = jnp.sum((e > 0.5).astype(f32)).reshape(1, 1)

    # Pad N to a lane-aligned size; padded samples are exactly neutral:
    #   y = +inf   -> never in any risk set (Cox den/num and pair count stay clean)
    #   pred = -inf -> zero concordance credit as the "later" member of a pair
    #   e = valid = 0 -> excluded from every row-wise term and e-masked sum.
    n_padded = _round_up(N, 128)
    tm = row_tile if row_tile is not None else _pick_tile(n_padded, (256, 128))
    tn = col_tile if col_tile is not None else _pick_tile(n_padded, (1024, 512, 256, 128))
    assert n_padded % tm == 0 and tm % 128 == 0
    assert n_padded % tn == 0 and tn % 128 == 0
    pad = n_padded - N

    def padr(x, value=0.0):
        return jnp.pad(x, ((0, pad), (0, 0)), constant_values=value) if pad else x

    es_p = padr(event_seq, 0.5)
    s_p = padr(s)
    y_p = padr(y, float("inf"))
    e_p = padr(e)
    pred_p = padr(pred, float("-inf"))
    valid_p = padr(jnp.ones((N, 1), f32))
    rp_p = padr(risk_pred)

    # bf16 hi/lo split of exp(risk_pred): single-pass MXU matmul, ~2^-17 relative error.
    exp_rp = jnp.exp(rp_p[:, 0]) * valid_p[:, 0]
    exp_hi = exp_rp.astype(jnp.bfloat16)
    exp_lo = (exp_rp - exp_hi.astype(f32)).astype(jnp.bfloat16)
    ones_row = valid_p[:, 0].astype(jnp.bfloat16)
    emask_row = ((e_p[:, 0] > 0.5).astype(f32) * valid_p[:, 0]).astype(jnp.bfloat16)
    zeros_row = jnp.zeros((n_padded,), jnp.bfloat16)
    lhs = jnp.stack([exp_hi, exp_lo, ones_row, emask_row,
                     zeros_row, zeros_row, zeros_row, zeros_row], axis=0)  # (8, Np) bf16

    y_row = y_p.reshape(1, n_padded)
    e_row = e_p.reshape(1, n_padded)
    pred_row = pred_p.reshape(1, n_padded)

    ni = n_padded // tm
    nj = n_padded // tn

    kernel = functools.partial(
        _event_loss_kernel, alpha=float(alpha), beta=float(beta), gamma=float(gamma),
        n_valid=float(N), t_len=float(T))

    out = pl.pallas_call(
        kernel,
        out_shape=jax.ShapeDtypeStruct((1, 1), jnp.float32),
        grid=(ni, nj),
        in_specs=[
            pl.BlockSpec((tm, T), lambda i, j: (i, 0)),    # event_seq row tile
            pl.BlockSpec((tm, T), lambda i, j: (i, 0)),    # s         row tile
            pl.BlockSpec((tm, 1), lambda i, j: (i, 0)),    # y         column view
            pl.BlockSpec((tm, 1), lambda i, j: (i, 0)),    # e         column view
            pl.BlockSpec((tm, 1), lambda i, j: (i, 0)),    # pred      column view
            pl.BlockSpec((tm, 1), lambda i, j: (i, 0)),    # valid     column view
            pl.BlockSpec((8, tm), lambda i, j: (0, i)),    # bf16 lhs rows for the MXU
            pl.BlockSpec((1, tn), lambda i, j: (0, j)),    # y     lane tile
            pl.BlockSpec((1, tn), lambda i, j: (0, j)),    # e     lane tile
            pl.BlockSpec((1, tn), lambda i, j: (0, j)),    # pred  lane tile
            pl.BlockSpec((1, 1), lambda i, j: (0, 0)),     # sum(risk_pred * e)
            pl.BlockSpec((1, 1), lambda i, j: (0, 0)),     # sum(e)
            pl.BlockSpec((1, 1), lambda i, j: (0, 0)),     # #(e > 0.5)
        ],
        out_specs=pl.BlockSpec((1, 1), lambda i, j: (0, 0)),
        scratch_shapes=[
            pltpu.VMEM((nj, 8, tn), jnp.float32),  # Cox num(hi,lo)/den + e-mask column sums
            pltpu.VMEM((1, 1), jnp.float32),       # BCE(event_seq, s) running sum
            pltpu.VMEM((1, 1), jnp.float32),       # BCE(surv, 1-e)    running sum
            pltpu.VMEM((1, 1), jnp.float32),       # concordance numerator
            pltpu.VMEM((1, 1), jnp.float32),       # sum_b acc[3, b] (pair-count complement)
            pltpu.VMEM((1, 1), jnp.float32),       # sum_j log(num/den) * e
        ],
        compiler_params=pltpu.CompilerParams(
            dimension_semantics=("arbitrary", "arbitrary"),
            vmem_limit_bytes=32 * 1024 * 1024),
    )(es_p, s_p, y_p, e_p, pred_p, valid_p, lhs, y_row, e_row, pred_row,
      rpe_s, sume_s, semask_s)
    return out[0, 0]


def event_loss_reference(risk_pred, event_seq, y, e, s, *, alpha, beta, gamma):
    """Pure-JAX mirror of the PyTorch module (for verification only)."""
    N, T = s.shape
    tte = jnp.argmax(s, axis=1)
    gathered = event_seq[jnp.arange(N), tte]
    mask = (jnp.arange(T)[None, :] < tte[:, None]).astype(jnp.float32)
    surv = jnp.prod(1.0 - event_seq * mask, axis=1)
    c = 1.0 - e[:, 0]

    mask2 = (y.T - y <= 0.0).astype(jnp.float32)
    ll = jnp.log(jnp.sum(jnp.exp(risk_pred) * mask2, axis=0)
                 / jnp.sum(mask2, axis=0)).reshape(-1, 1)
    loss1 = -jnp.sum((risk_pred - ll) * e) / jnp.sum(e)

    clog = lambda x: jnp.maximum(jnp.log(x), -100.0)
    loss2 = jnp.mean(-(s * clog(event_seq) + (1.0 - s) * clog(1.0 - event_seq)))

    # TODO(synk): lifelines' exact tie/censoring handling is not reproduced; Harrell's C
    # with 0.5 tie credit and tie-free event times is assumed (as in the kernel).
    pred = -(e[:, 0] * gathered)
    comp = ((y < y.T) & (e > 0.5)).astype(jnp.float32)
    conc = jnp.where(pred[:, None] < pred[None, :], 1.0,
                     jnp.where(pred[:, None] == pred[None, :], 0.5, 0.0))
    loss3 = 1.0 - jnp.sum(comp * conc) / jnp.sum(comp)

    loss4 = jnp.mean(-(c * clog(surv) + (1.0 - c) * clog(1.0 - surv)))
    return loss1 + alpha * loss2 + beta * loss3 + gamma * loss4


if __name__ == "__main__":
    alpha, beta, gamma = 0.5, 0.3, 0.2

    def make_inputs(key, n, t):
        k1, k2, k3, k4, k5 = jax.random.split(key, 5)
        risk_pred = jax.random.normal(k1, (n, 1), dtype=jnp.float32)
        event_seq = jax.nn.sigmoid(jax.random.normal(k2, (n, t), dtype=jnp.float32))
        y = jax.random.uniform(k3, (n, 1), minval=1.0, maxval=10.0, dtype=jnp.float32)
        e = (jax.random.uniform(k4, (n, 1), dtype=jnp.float32) < 0.7).astype(jnp.float32)
        # guarantee at least one event at a non-maximal time and one censored sample
        y = y.at[0, 0].set(0.5)
        e = e.at[0, 0].set(1.0)
        e = e.at[-1, 0].set(0.0)
        tte_idx = jax.random.randint(k5, (n,), 0, t)
        s = jax.nn.one_hot(tte_idx, t, dtype=jnp.float32)
        return risk_pred, event_seq, y, e, s

    key = jax.random.PRNGKey(0)
    k1, k2, k3 = jax.random.split(key, 3)

    # tiny shape: heavy padding path (8 -> 128), grid = (1, 1)
    args = make_inputs(k1, 8, 16)
    out = jax.block_until_ready(event_loss(*args, alpha=alpha, beta=beta, gamma=gamma))
    ref = event_loss_reference(*args, alpha=alpha, beta=beta, gamma=gamma)
    np.testing.assert_allclose(np.asarray(out), np.asarray(ref), rtol=2e-4, atol=2e-4)

    # awkward N: pads 300 -> 384, multi-tile in both grid axes (grid = (3, 3))
    args = make_inputs(k2, 300, 24)
    out = jax.block_until_ready(event_loss(*args, alpha=alpha, beta=beta, gamma=gamma))
    ref = event_loss_reference(*args, alpha=alpha, beta=beta, gamma=gamma)
    np.testing.assert_allclose(np.asarray(out), np.asarray(ref), rtol=2e-4, atol=2e-4)

    # no-padding multi-tile case with explicit tile sizes (grid = (2, 2))
    args = make_inputs(k3, 512, 16)
    out = jax.block_until_ready(
        event_loss(*args, alpha=alpha, beta=beta, gamma=gamma, row_tile=256, col_tile=256))
    ref = event_loss_reference(*args, alpha=alpha, beta=beta, gamma=gamma)
    np.testing.assert_allclose(np.asarray(out), np.asarray(ref), rtol=2e-4, atol=2e-4)

    print("KERNEL_OK")
</pallas_src>

<mosaic_0001>
module attributes {stable_mosaic.version = 11 : i64} {
  func.func @_event_loss_kernel(%arg0: i32, %arg1: i32, %arg2: memref<128x16xf32, #tpu.memory_space<vmem>>, %arg3: memref<128x16xf32, #tpu.memory_space<vmem>>, %arg4: memref<128x1xf32, #tpu.memory_space<vmem>>, %arg5: memref<128x1xf32, #tpu.memory_space<vmem>>, %arg6: memref<128x1xf32, #tpu.memory_space<vmem>>, %arg7: memref<128x1xf32, #tpu.memory_space<vmem>>, %arg8: memref<8x128xbf16, #tpu.memory_space<vmem>>, %arg9: memref<1x128xf32, #tpu.memory_space<vmem>>, %arg10: memref<1x128xf32, #tpu.memory_space<vmem>>, %arg11: memref<1x128xf32, #tpu.memory_space<vmem>>, %arg12: memref<1x1xf32, #tpu.memory_space<vmem>>, %arg13: memref<1x1xf32, #tpu.memory_space<vmem>>, %arg14: memref<1x1xf32, #tpu.memory_space<vmem>>, %arg15: memref<1x1xf32, #tpu.memory_space<vmem>>, %arg16: memref<1x8x128xf32, #tpu.memory_space<vmem>>, %arg17: memref<1x1xf32, #tpu.memory_space<vmem>>, %arg18: memref<1x1xf32, #tpu.memory_space<vmem>>, %arg19: memref<1x1xf32, #tpu.memory_space<vmem>>, %arg20: memref<1x1xf32, #tpu.memory_space<vmem>>, %arg21: memref<1x1xf32, #tpu.memory_space<vmem>>) attributes {dimension_semantics = [#tpu.dimension_semantics<arbitrary>, #tpu.dimension_semantics<arbitrary>], iteration_bounds = array<i64: 1, 1>, scalar_prefetch = 0 : i64, scratch_operands = 6 : i64, tpu.core_type = #tpu.core_type<tc>, window_params = [{transform_indices = @transform_0, window_bounds = array<i64: 128, 16>}, {transform_indices = @transform_1, window_bounds = array<i64: 128, 16>}, {transform_indices = @transform_2, window_bounds = array<i64: 128, 1>}, {transform_indices = @transform_3, window_bounds = array<i64: 128, 1>}, {transform_indices = @transform_4, window_bounds = array<i64: 128, 1>}, {transform_indices = @transform_5, window_bounds = array<i64: 128, 1>}, {transform_indices = @transform_6, window_bounds = array<i64: 8, 128>}, {transform_indices = @transform_7, window_bounds = array<i64: 1, 128>}, {transform_indices = @transform_8, window_bounds = array<i64: 1, 128>}, {transform_indices = @transform_9, window_bounds = array<i64: 1, 128>}, {pipeline_mode = #tpu.pipeline_mode<synchronous>, transform_indices = @transform_10, window_bounds = array<i64: 1, 1>}, {pipeline_mode = #tpu.pipeline_mode<synchronous>, transform_indices = @transform_11, window_bounds = array<i64: 1, 1>}, {pipeline_mode = #tpu.pipeline_mode<synchronous>, transform_indices = @transform_12, window_bounds = array<i64: 1, 1>}, {pipeline_mode = #tpu.pipeline_mode<synchronous>, transform_indices = @transform_13, window_bounds = array<i64: 1, 1>}]} {
    %c0_i32 = arith.constant 0 : i32
    %0 = arith.cmpi eq, %arg0, %c0_i32 : i32
    %c0_i32_0 = arith.constant 0 : i32
    %1 = arith.cmpi eq, %arg1, %c0_i32_0 : i32
    %2 = arith.andi %0, %1 : i1
    %3 = arith.extui %2 : i1 to i32
    %c0_i32_1 = arith.constant 0 : i32
    %4 = arith.cmpi ne, %3, %c0_i32_1 : i32
    scf.if %4 {
      %cst_39 = arith.constant 0.000000e+00 : f32
      %73 = vector.broadcast %cst_39 : f32 to vector<1x1xf32>
      %c0_40 = arith.constant 0 : index
      %c0_41 = arith.constant 0 : index
      %74 = vector.load %arg17[%c0_40, %c0_41] : memref<1x1xf32, #tpu.memory_space<vmem>>, vector<1x1xf32>
      tpu.vector_store %arg17[%c0_40, %c0_41], %73 {strides = array<i32>} : memref<1x1xf32, #tpu.memory_space<vmem>>, vector<1x1xf32>,
      %cst_42 = arith.constant 0.000000e+00 : f32
      %75 = vector.broadcast %cst_42 : f32 to vector<1x1xf32>
      %c0_43 = arith.constant 0 : index
      %c0_44 = arith.constant 0 : index
      %76 = vector.load %arg18[%c0_43, %c0_44] : memref<1x1xf32, #tpu.memory_space<vmem>>, vector<1x1xf32>
      tpu.vector_store %arg18[%c0_43, %c0_44], %75 {strides = array<i32>} : memref<1x1xf32, #tpu.memory_space<vmem>>, vector<1x1xf32>,
      %cst_45 = arith.constant 0.000000e+00 : f32
      %77 = vector.broadcast %cst_45 : f32 to vector<1x1xf32>
      %c0_46 = arith.constant 0 : index
      %c0_47 = arith.constant 0 : index
      %78 = vector.load %arg19[%c0_46, %c0_47] : memref<1x1xf32, #tpu.memory_space<vmem>>, vector<1x1xf32>
      tpu.vector_store %arg19[%c0_46, %c0_47], %77 {strides = array<i32>} : memref<1x1xf32, #tpu.memory_space<vmem>>, vector<1x1xf32>,
      %cst_48 = arith.constant 0.000000e+00 : f32
      %79 = vector.broadcast %cst_48 : f32 to vector<1x1xf32>
      %c0_49 = arith.constant 0 : index
      %c0_50 = arith.constant 0 : index
      %80 = vector.load %arg20[%c0_49, %c0_50] : memref<1x1xf32, #tpu.memory_space<vmem>>, vector<1x1xf32>
      tpu.vector_store %arg20[%c0_49, %c0_50], %79 {strides = array<i32>} : memref<1x1xf32, #tpu.memory_space<vmem>>, vector<1x1xf32>,
      %cst_51 = arith.constant 0.000000e+00 : f32
      %81 = vector.broadcast %cst_51 : f32 to vector<1x1xf32>
      %c0_52 = arith.constant 0 : index
      %c0_53 = arith.constant 0 : index
      %82 = vector.load %arg21[%c0_52, %c0_53] : memref<1x1xf32, #tpu.memory_space<vmem>>, vector<1x1xf32>
      tpu.vector_store %arg21[%c0_52, %c0_53], %81 {strides = array<i32>} : memref<1x1xf32, #tpu.memory_space<vmem>>, vector<1x1xf32>,
    } else {
    }
    %c0_i32_2 = arith.constant 0 : i32
    %5 = arith.cmpi eq, %arg0, %c0_i32_2 : i32
    %6 = arith.extui %5 : i1 to i32
    %c0_i32_3 = arith.constant 0 : i32
    %7 = arith.cmpi ne, %6, %c0_i32_3 : i32
    scf.if %7 {
      %cst_39 = arith.constant 0.000000e+00 : f32
      %73 = vector.broadcast %cst_39 : f32 to vector<8x128xf32>
      %74 = arith.index_cast %arg1 : i32 to index
      %c0_40 = arith.constant 0 : index
      %c0_41 = arith.constant 0 : index
      %75 = vector.load %arg16[%74, %c0_40, %c0_41] : memref<1x8x128xf32, #tpu.memory_space<vmem>>, vector<1x8x128xf32>
      %76 = vector.shape_cast %75 : vector<1x8x128xf32> to vector<8x128xf32>
      %77 = vector.shape_cast %73 : vector<8x128xf32> to vector<1x8x128xf32>
      tpu.vector_store %arg16[%74, %c0_40, %c0_41], %77 {strides = array<i32>} : memref<1x8x128xf32, #tpu.memory_space<vmem>>, vector<1x8x128xf32>,
    } else {
    }
    %c0 = arith.constant 0 : index
    %c0_4 = arith.constant 0 : index
    %8 = vector.load %arg4[%c0, %c0_4] : memref<128x1xf32, #tpu.memory_space<vmem>>, vector<128x1xf32>
    %c0_5 = arith.constant 0 : index
    %c0_6 = arith.constant 0 : index
    %9 = vector.load %arg5[%c0_5, %c0_6] : memref<128x1xf32, #tpu.memory_space<vmem>>, vector<128x1xf32>
    %c0_7 = arith.constant 0 : index
    %c0_8 = arith.constant 0 : index
    %10 = vector.load %arg6[%c0_7, %c0_8] : memref<128x1xf32, #tpu.memory_space<vmem>>, vector<128x1xf32>
    %c0_9 = arith.constant 0 : index
    %c0_10 = arith.constant 0 : index
    %11 = vector.load %arg7[%c0_9, %c0_10] : memref<128x1xf32, #tpu.memory_space<vmem>>, vector<128x1xf32>
    %c0_11 = arith.constant 0 : index
    %c0_12 = arith.constant 0 : index
    %12 = vector.load %arg9[%c0_11, %c0_12] : memref<1x128xf32, #tpu.memory_space<vmem>>, vector<1x128xf32>
    %c0_13 = arith.constant 0 : index
    %c0_14 = arith.constant 0 : index
    %13 = vector.load %arg10[%c0_13, %c0_14] : memref<1x128xf32, #tpu.memory_space<vmem>>, vector<1x128xf32>
    %c0_15 = arith.constant 0 : index
    %c0_16 = arith.constant 0 : index
    %14 = vector.load %arg11[%c0_15, %c0_16] : memref<1x128xf32, #tpu.memory_space<vmem>>, vector<1x128xf32>
    %c0_i32_17 = arith.constant 0 : i32
    %15 = arith.cmpi eq, %arg1, %c0_i32_17 : i32
    %16 = arith.extui %15 : i1 to i32
    %c0_i32_18 = arith.constant 0 : i32
    %17 = arith.cmpi ne, %16, %c0_i32_18 : i32
    scf.if %17 {
      %c0_39 = arith.constant 0 : index
      %c0_40 = arith.constant 0 : index
      %73 = vector.load %arg2[%c0_39, %c0_40] : memref<128x16xf32, #tpu.memory_space<vmem>>, vector<128x16xf32>
      %c0_41 = arith.constant 0 : index
      %c0_42 = arith.constant 0 : index
      %74 = vector.load %arg3[%c0_41, %c0_42] : memref<128x16xf32, #tpu.memory_space<vmem>>, vector<128x16xf32>
      %75 = tpu.iota {dimensions = array<i32: 1>} : vector<128x16xi32>
      %76 = arith.sitofp %75 : vector<128x16xi32> to vector<128x16xf32>
      %77 = arith.mulf %74, %76 : vector<128x16xf32>
      %cst_43 = arith.constant dense<0.000000e+00> : vector<128xf32>
      %78 = vector.multi_reduction <add>, %77, %cst_43 [1] : vector<128x16xf32> to vector<128xf32>
      %79 = vector.shape_cast %78 : vector<128xf32> to vector<128x1xf32>
      %80 = arith.mulf %73, %74 : vector<128x16xf32>
      %cst_44 = arith.constant dense<0.000000e+00> : vector<128xf32>
      %81 = vector.multi_reduction <add>, %80, %cst_44 [1] : vector<128x16xf32> to vector<128xf32>
      %82 = vector.shape_cast %81 : vector<128xf32> to vector<128x1xf32>
      %cst_45 = arith.constant 1.000000e+00 : f32
      %83 = vector.broadcast %cst_45 : f32 to vector<128x16xf32>
      %84 = arith.subf %83, %73 : vector<128x16xf32>
      %85 = math.log %84 : vector<128x16xf32>
      %cst_46 = arith.constant -1.000000e+02 : f32
      %86 = vector.broadcast %cst_46 : f32 to vector<128x16xf32>
      %87 = arith.maximumf %85, %86 : vector<128x16xf32>
      %cst_47 = arith.constant dense<0.000000e+00> : vector<128xf32>
      %88 = vector.multi_reduction <add>, %87, %cst_47 [1] : vector<128x16xf32> to vector<128xf32>
      %89 = vector.shape_cast %88 : vector<128xf32> to vector<128x1xf32>
      %90 = arith.mulf %74, %87 : vector<128x16xf32>
      %cst_48 = arith.constant dense<0.000000e+00> : vector<128xf32>
      %91 = vector.multi_reduction <add>, %90, %cst_48 [1] : vector<128x16xf32> to vector<128xf32>
      %92 = vector.shape_cast %91 : vector<128xf32> to vector<128x1xf32>
      %93 = arith.subf %92, %89 : vector<128x1xf32>
      %94 = math.log %82 : vector<128x1xf32>
      %cst_49 = arith.constant -1.000000e+02 : f32
      %95 = vector.broadcast %cst_49 : f32 to vector<128x1xf32>
      %96 = arith.maximumf %94, %95 : vector<128x1xf32>
      %97 = arith.subf %93, %96 : vector<128x1xf32>
      %c0_50 = arith.constant 0 : index
      %c0_51 = arith.constant 0 : index
      %98 = vector.load %arg17[%c0_50, %c0_51] : memref<1x1xf32, #tpu.memory_space<vmem>>, vector<1x1xf32>
      %99 = arith.mulf %11, %97 : vector<128x1xf32>
      %100 = vector.shape_cast %99 : vector<128x1xf32> to vector<1x128x1xf32>
      %cst_52 = arith.constant dense<0.000000e+00> : vector<1xf32>
      %101 = vector.multi_reduction <add>, %100, %cst_52 [1, 2] : vector<1x128x1xf32> to vector<1xf32>
      %102 = vector.shape_cast %101 : vector<1xf32> to vector<1x1x1xf32>
      %103 = vector.extract %102[0, 0, 0] : f32 from vector<1x1x1xf32>
      %104 = vector.broadcast %103 : f32 to vector<1x1xf32>
      %105 = arith.addf %98, %104 : vector<1x1xf32>
      %c0_53 = arith.constant 0 : index
      %c0_54 = arith.constant 0 : index
      %106 = vector.load %arg17[%c0_53, %c0_54] : memref<1x1xf32, #tpu.memory_space<vmem>>, vector<1x1xf32>
      tpu.vector_store %arg17[%c0_53, %c0_54], %105 {strides = array<i32>} : memref<1x1xf32, #tpu.memory_space<vmem>>, vector<1x1xf32>,
      %107 = vector.broadcast %79 : vector<128x1xf32> to vector<128x16xf32>
      %108 = arith.cmpf olt, %76, %107 : vector<128x16xf32>
      %109 = arith.extui %108 : vector<128x16xi1> to vector<128x16xi32>
      %110 = arith.sitofp %109 : vector<128x16xi32> to vector<128x16xf32>
      %111 = arith.mulf %110, %87 : vector<128x16xf32>
      %cst_55 = arith.constant dense<0.000000e+00> : vector<128xf32>
      %112 = vector.multi_reduction <add>, %111, %cst_55 [1] : vector<128x16xf32> to vector<128xf32>
      %113 = vector.shape_cast %112 : vector<128xf32> to vector<128x1xf32>
      %114 = math.exp %113 : vector<128x1xf32>
      %cst_56 = arith.constant 1.000000e+00 : f32
      %115 = vector.broadcast %cst_56 : f32 to vector<128x1xf32>
      %116 = arith.subf %115, %9 : vector<128x1xf32>
      %cst_57 = arith.constant -1.000000e+02 : f32
      %117 = vector.broadcast %cst_57 : f32 to vector<128x1xf32>
      %118 = arith.maximumf %113, %117 : vector<128x1xf32>
      %119 = arith.mulf %116, %118 : vector<128x1xf32>
      %cst_58 = arith.constant 1.000000e+00 : f32
      %120 = vector.broadcast %cst_58 : f32 to vector<128x1xf32>
      %121 = arith.subf %120, %116 : vector<128x1xf32>
      %cst_59 = arith.constant 1.000000e+00 : f32
      %122 = vector.broadcast %cst_59 : f32 to vector<128x1xf32>
      %123 = arith.subf %122, %114 : vector<128x1xf32>
      %124 = math.log %123 : vector<128x1xf32>
      %cst_60 = arith.constant -1.000000e+02 : f32
      %125 = vector.broadcast %cst_60 : f32 to vector<128x1xf32>
      %126 = arith.maximumf %124, %125 : vector<128x1xf32>
      %127 = arith.mulf %121, %126 : vector<128x1xf32>
      %128 = arith.addf %119, %127 : vector<128x1xf32>
      %cst_61 = arith.constant 0.000000e+00 : f32
      %129 = vector.broadcast %cst_61 : f32 to vector<128x1xf32>
      %130 = arith.subf %129, %128 : vector<128x1xf32>
      %c0_62 = arith.constant 0 : index
      %c0_63 = arith.constant 0 : index
      %131 = vector.load %arg18[%c0_62, %c0_63] : memref<1x1xf32, #tpu.memory_space<vmem>>, vector<1x1xf32>
      %132 = arith.mulf %11, %130 : vector<128x1xf32>
      %133 = vector.shape_cast %132 : vector<128x1xf32> to vector<1x128x1xf32>
      %cst_64 = arith.constant dense<0.000000e+00> : vector<1xf32>
      %134 = vector.multi_reduction <add>, %133, %cst_64 [1, 2] : vector<1x128x1xf32> to vector<1xf32>
      %135 = vector.shape_cast %134 : vector<1xf32> to vector<1x1x1xf32>
      %136 = vector.extract %135[0, 0, 0] : f32 from vector<1x1x1xf32>
      %137 = vector.broadcast %136 : f32 to vector<1x1xf32>
      %138 = arith.addf %131, %137 : vector<1x1xf32>
      %c0_65 = arith.constant 0 : index
      %c0_66 = arith.constant 0 : index
      %139 = vector.load %arg18[%c0_65, %c0_66] : memref<1x1xf32, #tpu.memory_space<vmem>>, vector<1x1xf32>
      tpu.vector_store %arg18[%c0_65, %c0_66], %138 {strides = array<i32>} : memref<1x1xf32, #tpu.memory_space<vmem>>, vector<1x1xf32>,
    } else {
    }
    %18 = vector.broadcast %12 : vector<1x128xf32> to vector<128x128xf32>
    %19 = vector.broadcast %8 : vector<128x1xf32> to vector<128x128xf32>
    %20 = arith.cmpf ole, %18, %19 : vector<128x128xf32>
    %21 = arith.extui %20 : vector<128x128xi1> to vector<128x128xi32>
    %22 = arith.sitofp %21 : vector<128x128xi32> to vector<128x128xf32>
    %23 = arith.truncf %22 : vector<128x128xf32> to vector<128x128xbf16>
    %c0_19 = arith.constant 0 : index
    %c0_20 = arith.constant 0 : index
    %24 = vector.load %arg8[%c0_19, %c0_20] : memref<8x128xbf16, #tpu.memory_space<vmem>>, vector<8x128xbf16>
    %cst = arith.constant dense<0.000000e+00> : vector<8x128xf32>
    %25 = tpu.matmul %24, %23, %cst {dimension_numbers = #tpu.dot_dimension_numbers<[1], [0], [0], [1], [0, 0, 1, 1], [], []>} : vector<8x128xbf16>, vector<128x128xbf16>, vector<8x128xf32> -> vector<8x128xf32>
    %26 = arith.index_cast %arg1 : i32 to index
    %c0_21 = arith.constant 0 : index
    %c0_22 = arith.constant 0 : index
    %27 = vector.load %arg16[%26, %c0_21, %c0_22] : memref<1x8x128xf32, #tpu.memory_space<vmem>>, vector<1x8x128xf32>
    %28 = vector.shape_cast %27 : vector<1x8x128xf32> to vector<8x128xf32>
    %29 = arith.addf %28, %25 : vector<8x128xf32>
    %30 = arith.index_cast %arg1 : i32 to index
    %c0_23 = arith.constant 0 : index
    %c0_24 = arith.constant 0 : index
    %31 = vector.load %arg16[%30, %c0_23, %c0_24] : memref<1x8x128xf32, #tpu.memory_space<vmem>>, vector<1x8x128xf32>
    %32 = vector.shape_cast %31 : vector<1x8x128xf32> to vector<8x128xf32>
    %33 = vector.shape_cast %29 : vector<8x128xf32> to vector<1x8x128xf32>
    tpu.vector_store %arg16[%30, %c0_23, %c0_24], %33 {strides = array<i32>} : memref<1x8x128xf32, #tpu.memory_space<vmem>>, vector<1x8x128xf32>,
    %34 = vector.broadcast %10 : vector<128x1xf32> to vector<128x128xf32>
    %35 = vector.broadcast %14 : vector<1x128xf32> to vector<128x128xf32>
    %36 = arith.cmpf olt, %34, %35 : vector<128x128xf32>
    %37 = arith.extui %36 : vector<128x128xi1> to vector<128x128xi32>
    %38 = arith.sitofp %37 : vector<128x128xi32> to vector<128x128xf32>
    %39 = vector.broadcast %10 : vector<128x1xf32> to vector<128x128xf32>
    %40 = vector.broadcast %14 : vector<1x128xf32> to vector<128x128xf32>
    %41 = arith.cmpf ole, %39, %40 : vector<128x128xf32>
    %42 = arith.extui %41 : vector<128x128xi1> to vector<128x128xi32>
    %43 = arith.sitofp %42 : vector<128x128xi32> to vector<128x128xf32>
    %44 = arith.addf %38, %43 : vector<128x128xf32>
    %cst_25 = arith.constant 0.000000e+00 : f32
    %45 = vector.broadcast %cst_25 : f32 to vector<128x128xf32>
    %46 = arith.select %20, %45, %44 : vector<128x128xi1>, vector<128x128xf32>
    %cst_26 = arith.constant dense<0.000000e+00> : vector<128xf32>
    %47 = vector.multi_reduction <add>, %46, %cst_26 [1] : vector<128x128xf32> to vector<128xf32>
    %48 = vector.shape_cast %47 : vector<128xf32> to vector<128x1xf32>
    %cst_27 = arith.constant 5.000000e-01 : f32
    %49 = vector.broadcast %cst_27 : f32 to vector<128x1xf32>
    %50 = arith.cmpf ogt, %9, %49 : vector<128x1xf32>
    %51 = arith.extui %50 : vector<128x1xi1> to vector<128x1xi32>
    %52 = arith.sitofp %51 : vector<128x1xi32> to vector<128x1xf32>
    %53 = arith.mulf %52, %11 : vector<128x1xf32>
    %c0_28 = arith.constant 0 : index
    %c0_29 = arith.constant 0 : index
    %54 = vector.load %arg19[%c0_28, %c0_29] : memref<1x1xf32, #tpu.memory_space<vmem>>, vector<1x1xf32>
    %55 = arith.mulf %53, %48 : vector<128x1xf32>
    %56 = vector.shape_cast %55 : vector<128x1xf32> to vector<1x128x1xf32>
    %cst_30 = arith.constant dense<0.000000e+00> : vector<1xf32>
    %57 = vector.multi_reduction <add>, %56, %cst_30 [1, 2] : vector<1x128x1xf32> to vector<1xf32>
    %58 = vector.shape_cast %57 : vector<1xf32> to vector<1x1x1xf32>
    %59 = vector.extract %58[0, 0, 0] : f32 from vector<1x1x1xf32>
    %60 = vector.broadcast %59 : f32 to vector<1x1xf32>
    %cst_31 = arith.constant 5.000000e-01 : f32
    %61 = vector.broadcast %cst_31 : f32 to vector<1x1xf32>
    %62 = arith.mulf %60, %61 : vector<1x1xf32>
    %63 = arith.addf %54, %62 : vector<1x1xf32>
    %c0_32 = arith.constant 0 : index
    %c0_33 = arith.constant 0 : index
    %64 = vector.load %arg19[%c0_32, %c0_33] : memref<1x1xf32, #tpu.memory_space<vmem>>, vector<1x1xf32>
    tpu.vector_store %arg19[%c0_32, %c0_33], %63 {strides = array<i32>} : memref<1x1xf32, #tpu.memory_space<vmem>>, vector<1x1xf32>,
    %c0_i32_34 = arith.constant 0 : i32
    %65 = arith.cmpi eq, %arg0, %c0_i32_34 : i32
    %66 = arith.extui %65 : i1 to i32
    %c0_i32_35 = arith.constant 0 : i32
    %67 = arith.cmpi ne, %66, %c0_i32_35 : i32
    scf.if %67 {
      %73 = vector.extract_strided_slice %29 {offsets = [0, 0], sizes = [1, 128], strides = [1, 1]} : vector<8x128xf32> to vector<1x128xf32>
      %74 = vector.extract_strided_slice %29 {offsets = [1, 0], sizes = [1, 128], strides = [1, 1]} : vector<8x128xf32> to vector<1x128xf32>
      %75 = arith.addf %73, %74 : vector<1x128xf32>
      %76 = vector.extract_strided_slice %29 {offsets = [2, 0], sizes = [1, 128], strides = [1, 1]} : vector<8x128xf32> to vector<1x128xf32>
      %cst_39 = arith.constant 0.000000e+00 : f32
      %77 = vector.broadcast %cst_39 : f32 to vector<1x128xf32>
      %78 = arith.cmpf ogt, %13, %77 : vector<1x128xf32>
      %79 = arith.divf %75, %76 : vector<1x128xf32>
      %80 = math.log %79 : vector<1x128xf32>
      %cst_40 = arith.constant 0.000000e+00 : f32
      %81 = vector.broadcast %cst_40 : f32 to vector<1x128xf32>
      %82 = arith.select %78, %80, %81 : vector<1x128xi1>, vector<1x128xf32>
      %c0_41 = arith.constant 0 : index
      %c0_42 = arith.constant 0 : index
      %83 = vector.load %arg21[%c0_41, %c0_42] : memref<1x1xf32, #tpu.memory_space<vmem>>, vector<1x1xf32>
      %84 = arith.mulf %82, %13 : vector<1x128xf32>
      %85 = vector.shape_cast %84 : vector<1x128xf32> to vector<1x1x128xf32>
      %cst_43 = arith.constant dense<0.000000e+00> : vector<1xf32>
      %86 = vector.multi_reduction <add>, %85, %cst_43 [1, 2] : vector<1x1x128xf32> to vector<1xf32>
      %87 = vector.shape_cast %86 : vector<1xf32> to vector<1x1x1xf32>
      %88 = vector.extract %87[0, 0, 0] : f32 from vector<1x1x1xf32>
      %89 = vector.broadcast %88 : f32 to vector<1x1xf32>
      %90 = arith.addf %83, %89 : vector<1x1xf32>
      %c0_44 = arith.constant 0 : index
      %c0_45 = arith.constant 0 : index
      %91 = vector.load %arg21[%c0_44, %c0_45] : memref<1x1xf32, #tpu.memory_space<vmem>>, vector<1x1xf32>
      tpu.vector_store %arg21[%c0_44, %c0_45], %90 {strides = array<i32>} : memref<1x1xf32, #tpu.memory_space<vmem>>, vector<1x1xf32>,
      %c0_46 = arith.constant 0 : index
      %c0_47 = arith.constant 0 : index
      %92 = vector.load %arg20[%c0_46, %c0_47] : memref<1x1xf32, #tpu.memory_space<vmem>>, vector<1x1xf32>
      %93 = vector.extract_strided_slice %29 {offsets = [3, 0], sizes = [1, 128], strides = [1, 1]} : vector<8x128xf32> to vector<1x128xf32>
      %94 = vector.shape_cast %93 : vector<1x128xf32> to vector<1x1x128xf32>
      %cst_48 = arith.constant dense<0.000000e+00> : vector<1xf32>
      %95 = vector.multi_reduction <add>, %94, %cst_48 [1, 2] : vector<1x1x128xf32> to vector<1xf32>
      %96 = vector.shape_cast %95 : vector<1xf32> to vector<1x1x1xf32>
      %97 = vector.extract %96[0, 0, 0] : f32 from vector<1x1x1xf32>
      %98 = vector.broadcast %97 : f32 to vector<1x1xf32>
      %99 = arith.addf %92, %98 : vector<1x1xf32>
      %c0_49 = arith.constant 0 : index
      %c0_50 = arith.constant 0 : index
      %100 = vector.load %arg20[%c0_49, %c0_50] : memref<1x1xf32, #tpu.memory_space<vmem>>, vector<1x1xf32>
      tpu.vector_store %arg20[%c0_49, %c0_50], %99 {strides = array<i32>} : memref<1x1xf32, #tpu.memory_space<vmem>>, vector<1x1xf32>,
    } else {
    }
    %c0_i32_36 = arith.constant 0 : i32
    %68 = arith.cmpi eq, %arg0, %c0_i32_36 : i32
    %c0_i32_37 = arith.constant 0 : i32
    %69 = arith.cmpi eq, %arg1, %c0_i32_37 : i32
    %70 = arith.andi %68, %69 : i1
    %71 = arith.extui %70 : i1 to i32
    %c0_i32_38 = arith.constant 0 : i32
    %72 = arith.cmpi ne, %71, %c0_i32_38 : i32
    scf.if %72 {
      %c0_39 = arith.constant 0 : index
      %c0_40 = arith.constant 0 : index
      %73 = vector.load %arg12[%c0_39, %c0_40] : memref<1x1xf32, #tpu.memory_space<vmem>>, vector<1x1xf32>
      %c0_41 = arith.constant 0 : index
      %c0_42 = arith.constant 0 : index
      %74 = vector.load %arg13[%c0_41, %c0_42] : memref<1x1xf32, #tpu.memory_space<vmem>>, vector<1x1xf32>
      %c0_43 = arith.constant 0 : index
      %c0_44 = arith.constant 0 : index
      %75 = vector.load %arg14[%c0_43, %c0_44] : memref<1x1xf32, #tpu.memory_space<vmem>>, vector<1x1xf32>
      %c0_45 = arith.constant 0 : index
      %c0_46 = arith.constant 0 : index
      %76 = vector.load %arg21[%c0_45, %c0_46] : memref<1x1xf32, #tpu.memory_space<vmem>>, vector<1x1xf32>
      %77 = arith.subf %73, %76 : vector<1x1xf32>
      %cst_47 = arith.constant 0.000000e+00 : f32
      %78 = vector.broadcast %cst_47 : f32 to vector<1x1xf32>
      %79 = arith.subf %78, %77 : vector<1x1xf32>
      %80 = arith.divf %79, %74 : vector<1x1xf32>
      %c0_48 = arith.constant 0 : index
      %c0_49 = arith.constant 0 : index
      %81 = vector.load %arg17[%c0_48, %c0_49] : memref<1x1xf32, #tpu.memory_space<vmem>>, vector<1x1xf32>
      %cst_50 = arith.constant 1.280000e+02 : f32
      %82 = vector.broadcast %cst_50 : f32 to vector<1x1xf32>
      %83 = arith.divf %81, %82 : vector<1x1xf32>
      %cst_51 = arith.constant 8.000000e+00 : f32
      %84 = vector.broadcast %cst_51 : f32 to vector<1x1xf32>
      %85 = arith.mulf %84, %75 : vector<1x1xf32>
      %c0_52 = arith.constant 0 : index
      %c0_53 = arith.constant 0 : index
      %86 = vector.load %arg20[%c0_52, %c0_53] : memref<1x1xf32, #tpu.memory_space<vmem>>, vector<1x1xf32>
      %87 = arith.subf %85, %86 : vector<1x1xf32>
      %c0_54 = arith.constant 0 : index
      %c0_55 = arith.constant 0 : index
      %88 = vector.load %arg19[%c0_54, %c0_55] : memref<1x1xf32, #tpu.memory_space<vmem>>, vector<1x1xf32>
      %89 = arith.divf %88, %87 : vector<1x1xf32>
      %cst_56 = arith.constant 1.000000e+00 : f32
      %90 = vector.broadcast %cst_56 : f32 to vector<1x1xf32>
      %91 = arith.subf %90, %89 : vector<1x1xf32>
      %c0_57 = arith.constant 0 : index
      %c0_58 = arith.constant 0 : index
      %92 = vector.load %arg18[%c0_57, %c0_58] : memref<1x1xf32, #tpu.memory_space<vmem>>, vector<1x1xf32>
      %cst_59 = arith.constant 8.000000e+00 : f32
      %93 = vector.broadcast %cst_59 : f32 to vector<1x1xf32>
      %94 = arith.divf %92, %93 : vector<1x1xf32>
      %cst_60 = arith.constant 5.000000e-01 : f32
      %95 = vector.broadcast %cst_60 : f32 to vector<1x1xf32>
      %96 = arith.mulf %95, %83 : vector<1x1xf32>
      %97 = arith.addf %80, %96 : vector<1x1xf32>
      %cst_61 = arith.constant 3.000000e-01 : f32
      %98 = vector.broadcast %cst_61 : f32 to vector<1x1xf32>
      %99 = arith.mulf %98, %91 : vector<1x1xf32>
      %100 = arith.addf %97, %99 : vector<1x1xf32>
      %cst_62 = arith.constant 2.000000e-01 : f32
      %101 = vector.broadcast %cst_62 : f32 to vector<1x1xf32>
      %102 = arith.mulf %101, %94 : vector<1x1xf32>
      %103 = arith.addf %100, %102 : vector<1x1xf32>
      %c0_63 = arith.constant 0 : index
      %c0_64 = arith.constant 0 : index
      %104 = vector.load %arg15[%c0_63, %c0_64] : memref<1x1xf32, #tpu.memory_space<vmem>>, vector<1x1xf32>
      tpu.vector_store %arg15[%c0_63, %c0_64], %103 {strides = array<i32>} : memref<1x1xf32, #tpu.memory_space<vmem>>, vector<1x1xf32>,
    } else {
    }
    return
  }
  func.func @transform_0(%arg0: i32, %arg1: i32) -> (i32, i32) {
    %c0_i32 = arith.constant 0 : i32
    %c0_i32_0 = arith.constant 0 : i32
    return %arg0, %c0_i32 : i32, i32
  }
  func.func @transform_1(%arg0: i32, %arg1: i32) -> (i32, i32) {
    %c0_i32 = arith.constant 0 : i32
    %c0_i32_0 = arith.constant 0 : i32
    return %arg0, %c0_i32 : i32, i32
  }
  func.func @transform_2(%arg0: i32, %arg1: i32) -> (i32, i32) {
    %c0_i32 = arith.constant 0 : i32
    %c0_i32_0 = arith.constant 0 : i32
    return %arg0, %c0_i32 : i32, i32
  }
  func.func @transform_3(%arg0: i32, %arg1: i32) -> (i32, i32) {
    %c0_i32 = arith.constant 0 : i32
    %c0_i32_0 = arith.constant 0 : i32
    return %arg0, %c0_i32 : i32, i32
  }
  func.func @transform_4(%arg0: i32, %arg1: i32) -> (i32, i32) {
    %c0_i32 = arith.constant 0 : i32
    %c0_i32_0 = arith.constant 0 : i32
    return %arg0, %c0_i32 : i32, i32
  }
  func.func @transform_5(%arg0: i32, %arg1: i32) -> (i32, i32) {
    %c0_i32 = arith.constant 0 : i32
    %c0_i32_0 = arith.constant 0 : i32
    return %arg0, %c0_i32 : i32, i32
  }
  func.func @transform_6(%arg0: i32, %arg1: i32) -> (i32, i32) {
    %c0_i32 = arith.constant 0 : i32
    %c0_i32_0 = arith.constant 0 : i32
    return %c0_i32, %arg0 : i32, i32
  }
  func.func @transform_7(%arg0: i32, %arg1: i32) -> (i32, i32) {
    %c0_i32 = arith.constant 0 : i32
    %c0_i32_0 = arith.constant 0 : i32
    return %c0_i32, %arg1 : i32, i32
  }
  func.func @transform_8(%arg0: i32, %arg1: i32) -> (i32, i32) {
    %c0_i32 = arith.constant 0 : i32
    %c0_i32_0 = arith.constant 0 : i32
    return %c0_i32, %arg1 : i32, i32
  }
  func.func @transform_9(%arg0: i32, %arg1: i32) -> (i32, i32) {
    %c0_i32 = arith.constant 0 : i32
    %c0_i32_0 = arith.constant 0 : i32
    return %c0_i32, %arg1 : i32, i32
  }
  func.func @transform_10(%arg0: i32, %arg1: i32) -> (i32, i32) {
    %c0_i32 = arith.constant 0 : i32
    %c0_i32_0 = arith.constant 0 : i32
    %c0_i32_1 = arith.constant 0 : i32
    return %c0_i32, %c0_i32_0 : i32, i32
  }
  func.func @transform_11(%arg0: i32, %arg1: i32) -> (i32, i32) {
    %c0_i32 = arith.constant 0 : i32
    %c0_i32_0 = arith.constant 0 : i32
    %c0_i32_1 = arith.constant 0 : i32
    return %c0_i32, %c0_i32_0 : i32, i32
  }
  func.func @transform_12(%arg0: i32, %arg1: i32) -> (i32, i32) {
    %c0_i32 = arith.constant 0 : i32
    %c0_i32_0 = arith.constant 0 : i32
    %c0_i32_1 = arith.constant 0 : i32
    return %c0_i32, %c0_i32_0 : i32, i32
  }
  func.func @transform_13(%arg0: i32, %arg1: i32) -> (i32, i32) {
    %c0_i32 = arith.constant 0 : i32
    %c0_i32_0 = arith.constant 0 : i32
    %c0_i32_1 = arith.constant 0 : i32
    return %c0_i32, %c0_i32_0 : i32, i32
  }
}

</mosaic_0001>

<bundles_post_ra>
// kernel: tpu_custom_call.1
= control target key start
LH: loop header
LB: loop body
LE: loop exit
PB: predicated region body
PF: predicated region fallthrough
CT: control target
= control target key end

     0   :  { %s3540_s0 = inlined_call_operand.vmem [shape: f32[128,16], index: 0, kind: input, shape index: {}]   ;;  %s3541_s1 = inlined_call_operand.vmem [shape: f32[128,16], index: 1, kind: input, shape index: {}]   ;;  %s3542_s2 = inlined_call_operand.vmem [shape: f32[128,1], index: 2, kind: input, shape index: {}]   ;;  %s3543_s3 = inlined_call_operand.vmem [shape: f32[128,1], index: 3, kind: input, shape index: {}]   ;;  %s3544_s4 = inlined_call_operand.vmem [shape: f32[128,1], index: 4, kind: input, shape index: {}]   ;;  %s3545_s5 = inlined_call_operand.vmem [shape: f32[128,1], index: 5, kind: input, shape index: {}]   ;;  %s3546_s6 = inlined_call_operand.vmem [shape: bf16[8,128], index: 6, kind: input, shape index: {}]   ;;  %s3547_s7 = inlined_call_operand.vmem [shape: f32[1,128], index: 7, kind: input, shape index: {}]   ;;  %s3548_s8 = inlined_call_operand.vmem [shape: f32[1,128], index: 8, kind: input, shape index: {}]   ;;  %s3549_s9 = inlined_call_operand.vmem [shape: f32[1,128], index: 9, kind: input, shape index: {}]   ;;  %s3550_s10 = inlined_call_operand.<no memory space> [shape: f32[1,1], index: 10, kind: input, shape index: {}]   ;;  %s3551_s13 = inlined_call_operand.hbm [shape: f32[1,1], index: 13, kind: output, shape index: {}]   ;;  %s3552_s11 = inlined_call_operand.<no memory space> [shape: f32[1,1], index: 11, kind: input, shape index: {}]   ;;  %s3553_s12 = inlined_call_operand.<no memory space> [shape: f32[1,1], index: 12, kind: input, shape index: {}]  }
   0x1   :  { %v18_v0 = vstv %s3550_s10  ;;  %v20_v1 = vstv %s3552_s11  ;;  %v22_v2 = vstv %s3553_s12 }
   0x2   :  { %19 = vst [vmem:[#allocation8] sm:$0x1] %v18_v0 }
   0x3   :  { %21 = vst [vmem:[#allocation9] sm:$0x1] %v20_v1 }
   0x4   :  { %23 = vst [vmem:[#allocation10] sm:$0x1] %v22_v2 }
   0x5   :  { %v171_v3 = vlaneseq  ;;  %v2058_v5 = vld [vmem:[%s3541_s1 + $0x20] sm:$0xff]  ;;  %v2063_v6 = vld [vmem:[%s3541_s1 + $0x10] sm:$0xff]  ;;  %vm190_vm0 = vcmask 130048  }
   0x6   :  { %v2068_v7 = vld [vmem:[%s3541_s1] sm:$0xff] }
   0x7   :  { %v172_v4 = vand.u32 127, %v171_v3 }
   0x9   :  { %v2070_v8 = vcvt.s32.f32 %v172_v4 }
   0xa   :  { %24 = vsyncpa [#allocation12], 0  ;;  %v2081_v12 = vld [vmem:[%s3541_s1 + $0x28] sm:$0xff]  ;;  %v2086_v13 = vld [vmem:[%s3541_s1 + $0x18] sm:$0xff]  ;;  %s1975_s30 = smov [#allocation11]   ;;  %s1664_s16 = sshll.u32 %s3551_s13, 4  ;;  %s1665_s16 = int_to_ptr.hbm [resolvable:$true] %s1664_s16 }
   0xb   :  { %v178_v9 = vmul.f32 %v2070_v8, %v2058_v5  ;;  %v176_v10 = vmul.f32 %v2070_v8, %v2063_v6  ;;  %v174_v11 = vmul.f32 %v2070_v8, %v2068_v7  ;;  %v2094_v17 = vld [vmem:[%s3541_s1 + $0x8] sm:$0xff]  ;;  %v179_v18 = vmul.f32 %v2070_v8, %v2081_v12  ;;  %v2108_v24 = vld [vmem:[%s3541_s1 + $0x40] sm:$0xff]  ;;  %v2113_v25 = vld [vmem:[%s3541_s1 + $0x38] sm:$0xff]  ;;  %s1662_s14 = sshll.u32 %s1975_s30, 4  ;;  %s1663_s14 = int_to_ptr.vmem [resolvable:$true] %s1662_s14 }
   0xc   :  { %v177_v19 = vmul.f32 %v2070_v8, %v2086_v13  ;;  %v175_v20 = vmul.f32 %v2070_v8, %v2094_v17  ;;  %v2118_v26 = vld [vmem:[%s3541_s1 + $0x30] sm:$0xff]  ;;  %v182_v27 = vmul.f32 %v2070_v8, %v2108_v24  ;;  %v181_v28 = vmul.f32 %v2070_v8, %v2113_v25  ;;  %v2132_v33 = vld [vmem:[%s3541_s1 + $0x58] sm:$0xff]  ;;  %v2142_v35 = vld [vmem:[%s3541_s1 + $0x48] sm:$0xff] }
   0xd   :  { %v203_v14 = vsel %vm190_vm0, %v178_v9, 0.0  ;;  %v197_v15 = vsel %vm190_vm0, %v176_v10, 0.0  ;;  %v191_v16 = vsel %vm190_vm0, %v174_v11, 0.0  ;;  %v206_v21 = vsel %vm190_vm0, %v179_v18, 0.0  ;;  %v2137_v34 = vld [vmem:[%s3541_s1 + $0x50] sm:$0xff]  ;;  %v2161_v43 = vld [vmem:[%s3541_s1 + $0x68] sm:$0xff] }
   0xe   :  { %204 = vadd.xlane.f32.xlu2 %v203_v14  ;;  %198 = vadd.xlane.f32.xlu1 %v197_v15  ;;  %v200_v22 = vsel %vm190_vm0, %v177_v19, 0.0  ;;  %v194_v23 = vsel %vm190_vm0, %v175_v20, 0.0  ;;  %v180_v29 = vmul.f32 %v2070_v8, %v2118_v26  ;;  %v215_v30 = vsel %vm190_vm0, %v182_v27, 0.0  ;;  %v2156_v42 = vld [vmem:[%s3541_s1 + $0x70] sm:$0xff]  ;;  %v2166_v44 = vld [vmem:[%s3541_s1 + $0x60] sm:$0xff]  ;;  %v2180_v51 = vld [vmem:[%s3540_s0 + $0x8] sm:$0xff] }
   0xf   :  { %192 = vadd.xlane.f32.xlu0 %v191_v16  ;;  %v212_v31 = vsel %vm190_vm0, %v181_v28, 0.0  ;;  %v185_v36 = vmul.f32 %v2070_v8, %v2132_v33  ;;  %v184_v37 = vmul.f32 %v2070_v8, %v2137_v34  ;;  %v183_v38 = vmul.f32 %v2070_v8, %v2142_v35  ;;  %v139_v52 = vld [vmem:[%s3540_s0] sm:$0xff]  ;;  %v2188_v53 = vld [vmem:[%s3541_s1 + $0x78] sm:$0xff]  ;;  %v141_v62 = vld [vmem:[%s3540_s0 + $0x10] sm:$0xff] }
  0x10   :  { %v209_v32 = vsel %vm190_vm0, %v180_v29, 0.0  ;;  %v188_v45 = vmul.f32 %v2070_v8, %v2156_v42  ;;  %v187_v46 = vmul.f32 %v2070_v8, %v2161_v43  ;;  %v186_v47 = vmul.f32 %v2070_v8, %v2166_v44  ;;  %v2201_v60 = vld [vmem:[%s3540_s0 + $0x20] sm:$0xff]  ;;  %v142_v61 = vld [vmem:[%s3540_s0 + $0x18] sm:$0xff]  ;;  %v145_v10 = vld [vmem:[%s3540_s0 + $0x30] sm:$0xff] }
  0x11   :  { %v224_v39 = vsel %vm190_vm0, %v185_v36, 0.0  ;;  %v221_v40 = vsel %vm190_vm0, %v184_v37, 0.0  ;;  %v218_v41 = vsel %vm190_vm0, %v183_v38, 0.0  ;;  %v240_v54 = vmul.f32 %v2094_v17, %v2180_v51  ;;  %v2219_v9 = vld [vmem:[%s3540_s0 + $0x38] sm:$0xff]  ;;  %v2237_v20 = vld [vmem:[%s3540_s0 + $0x50] sm:$0xff] }
  0x12   :  { %v233_v48 = vsel %vm190_vm0, %v188_v45, 0.0  ;;  %v230_v49 = vsel %vm190_vm0, %v187_v46, 0.0  ;;  %v227_v50 = vsel %vm190_vm0, %v186_v47, 0.0  ;;  %v239_v55 = vmul.f32 %v2068_v7, %v139_v52 }
  0x13   :  { %v189_v56 = vmul.f32 %v2070_v8, %v2188_v53  ;;  %v258_v57 = vsel %vm190_vm0, %v240_v54, 0.0  ;;  %v243_v63 = vmul.f32 %v2058_v5, %v2201_v60  ;;  %v242_v0 = vmul.f32 %v2086_v13, %v142_v61  ;;  %v144_v5 = vld [vmem:[%s3540_s0 + $0x28] sm:$0xff] }
  0x14   :  { %v255_v58 = vsel %vm190_vm0, %v239_v55, 0.0  ;;  %v241_v1 = vmul.f32 %v2063_v6, %v141_v62  ;;  %v246_v11 = vmul.f32 %v2113_v25, %v2219_v9  ;;  %v245_v14 = vmul.f32 %v2118_v26, %v145_v10 }
  0x15   :  { %v236_v59 = vsel %vm190_vm0, %v189_v56, 0.0  ;;  %v267_v2 = vsel %vm190_vm0, %v243_v63, 0.0  ;;  %v264_v3 = vsel %vm190_vm0, %v242_v0, 0.0  ;;  %v244_v15 = vmul.f32 %v2081_v12, %v144_v5  ;;  %v2247_v12 = vld [vmem:[%s3540_s0 + $0x40] sm:$0xff] }
  0x16   :  { %207 = vadd.xlane.f32.xlu2 %v206_v21  ;;  %201 = vadd.xlane.f32.xlu1 %v200_v22  ;;  %v261_v4 = vsel %vm190_vm0, %v241_v1, 0.0  ;;  %v276_v16 = vsel %vm190_vm0, %v246_v11, 0.0  ;;  %v273_v18 = vsel %vm190_vm0, %v245_v14, 0.0  ;;  %v2242_v21 = vld [vmem:[%s3540_s0 + $0x48] sm:$0xff]  ;;  %v303_v22 = vsub.f32 1.0, %v139_v52 }
  0x17   :  { %195 = vadd.xlane.f32.xlu0 %v194_v23  ;;  %v270_v19 = vsel %vm190_vm0, %v244_v15, 0.0  ;;  %v249_v23 = vmul.f32 %v2137_v34, %v2237_v20  ;;  %v248_v25 = vmul.f32 %v2142_v35, %v2242_v21  ;;  %v247_v27 = vmul.f32 %v2108_v24, %v2247_v12  ;;  %v2271_v24 = vld [vmem:[%s3540_s0 + $0x58] sm:$0xff] }
  0x18   :  { %1790 = vlog2.f32 %v303_v22  ;;  %v305_v34 = vsub.f32 1.0, %v141_v62  ;;  %v306_v35 = vsub.f32 1.0, %v142_v61  ;;  %v304_v36 = vsub.f32 1.0, %v2180_v51 }
  0x19   :  { %v285_v28 = vsel %vm190_vm0, %v249_v23, 0.0  ;;  %v282_v29 = vsel %vm190_vm0, %v248_v25, 0.0  ;;  %v307_v47 = vsub.f32 1.0, %v2201_v60  ;;  %v310_v61 = vsub.f32 1.0, %v2219_v9 }
  0x1a   :  { %1792 = vlog2.f32 %v305_v34  ;;  %v312_v63 = vsub.f32 1.0, %v2242_v21  ;;  %v313_v22 = vsub.f32 1.0, %v2237_v20 }
  0x1b   :  { %1794 = vlog2.f32 %v306_v35 }
  0x1c   :  { %1796 = vlog2.f32 %v304_v36 }
  0x1d   :  { %1798 = vlog2.f32 %v307_v47 }
  0x1e   :  { %216 = vadd.xlane.f32.xlu2 %v215_v30  ;;  %213 = vadd.xlane.f32.xlu1 %v212_v31  ;;  %v279_v30 = vsel %vm190_vm0, %v247_v27, 0.0  ;;  %v2261_v31 = vld [vmem:[%s3540_s0 + $0x68] sm:$0xff] }
  0x1f   :  { %210 = vadd.xlane.f32.xlu0 %v209_v32  ;;  %v2266_v32 = vld [vmem:[%s3540_s0 + $0x60] sm:$0xff]  ;;  %v252_v37 = vmul.f32 %v2161_v43, %v2261_v31  ;;  %v2287_v43 = vld [vmem:[%s3540_s0 + $0x78] sm:$0xff]  ;;  %v316_v35 = vsub.f32 1.0, %v2261_v31 }
  0x20   :  { %v251_v38 = vmul.f32 %v2166_v44, %v2266_v32  ;;  %v308_v44 = vsub.f32 1.0, %v144_v5  ;;  %v254_v52 = vmul.f32 %v2188_v53, %v2287_v43  ;;  %v315_v21 = vsub.f32 1.0, %v2266_v32 }
  0x22   :  { %v291_v45 = vsel %vm190_vm0, %v251_v38, 0.0  ;;  %1800 = vlog2.f32 %v308_v44 }
  0x26   :  { %225 = vadd.xlane.f32.xlu2 %v224_v39  ;;  %222 = vadd.xlane.f32.xlu1 %v221_v40  ;;  %v1791_v39 = vpop.eup %1790  ;;  %v250_v40 = vmul.f32 %v2132_v33, %v2271_v24  ;;  %v2292_v33 = vld [vmem:[%s3540_s0 + $0x70] sm:$0xff] }
  0x27   :  { %219 = vadd.xlane.f32.xlu0 %v218_v41  ;;  %v294_v41 = vsel %vm190_vm0, %v252_v37, 0.0  ;;  %v320_v46 = vmul.f32 0.6931472, %v1791_v39  ;;  %v253_v55 = vmul.f32 %v2156_v42, %v2292_v33  ;;  %v311_v42 = vsub.f32 1.0, %v2247_v12 }
  0x28   :  { %v317_v36 = vsub.f32 1.0, %v2292_v33 }
  0x29   :  { %v2294_v51 = vmax.f32 %v320_v46, -100.0  ;;  %v297_v62 = vsel %vm190_vm0, %v253_v55, 0.0 }
  0x2e   :  { %234 = vadd.xlane.f32.xlu2 %v233_v48  ;;  %231 = vadd.xlane.f32.xlu1 %v230_v49  ;;  %v288_v48 = vsel %vm190_vm0, %v250_v40, 0.0  ;;  %v309_v49 = vsub.f32 1.0, %v145_v10 }
  0x2f   :  { %228 = vadd.xlane.f32.xlu0 %v227_v50  ;;  %v1793_v50 = vpop.eup %1792 }
  0x30   :  { %v1795_v54 = vpop.eup %1794  ;;  %1802 = vlog2.f32 %v309_v49  ;;  %v324_v60 = vmul.f32 0.6931472, %v1793_v50  ;;  %v1970_v49 = vmov 0  }
  0x31   :  { %v1797_v56 = vpop.eup %1796  ;;  %1804 = vlog2.f32 %v310_v61  ;;  %1785 = vset.pattern.permute.xlu2 %v1970_v49  ;;  %1786 = vset.pattern.permute.xlu0 %v1970_v49 }
  0x32   :  { %v322_v53 = vmul.f32 0.6931472, %v1797_v56  ;;  %v1799_v0 = vpop.eup %1798  ;;  %1806 = vlog2.f32 %v312_v63  ;;  %1787 = vset.pattern.permute.xlu1 %v1970_v49  ;;  %v76_v49 = vld [vmem:[%s3542_s2 + $0x38] sm:$0xff] }
  0x33   :  { %v1801_v1 = vpop.eup %1800  ;;  %1808 = vlog2.f32 %v311_v42 }
  0x34   :  { %v2311_v10 = vmax.f32 %v322_v53, -100.0  ;;  %v330_v14 = vmul.f32 0.6931472, %v1801_v1 }
  0x36   :  { %259 = vadd.xlane.f32.xlu2 %v258_v57  ;;  %256 = vadd.xlane.f32.xlu1 %v255_v58  ;;  %v367_v57 = vsel %vm190_vm0, %v2294_v51, 0.0  ;;  %v300_v58 = vsel %vm190_vm0, %v254_v52, 0.0  ;;  %v370_v15 = vsel %vm190_vm0, %v2311_v10, 0.0  ;;  %v2324_v25 = vmax.f32 %v330_v14, -100.0 }
  0x37   :  { %237 = vadd.xlane.f32.xlu0 %v236_v59  ;;  %v326_v59 = vmul.f32 0.6931472, %v1795_v54 }
  0x38   :  { %v382_v32 = vsel %vm190_vm0, %v2324_v25, 0.0 }
  0x3e   :  { %268 = vadd.xlane.f32.xlu2 %v267_v2  ;;  %265 = vadd.xlane.f32.xlu1 %v264_v3  ;;  %v2307_v2 = vmax.f32 %v326_v59, -100.0  ;;  %v2309_v3 = vmax.f32 %v324_v60, -100.0 }
  0x3f   :  { %262 = vadd.xlane.f32.xlu0 %v261_v4  ;;  %v1803_v4 = vpop.eup %1802 }
  0x40   :  { %v376_v9 = vsel %vm190_vm0, %v2307_v2, 0.0  ;;  %v373_v5 = vsel %vm190_vm0, %v2309_v3, 0.0  ;;  %v332_v11 = vmul.f32 0.6931472, %v1803_v4 }
  0x42   :  { %v2322_v23 = vmax.f32 %v332_v11, -100.0 }
  0x46   :  { %277 = vadd.xlane.f32.xlu2 %v276_v16  ;;  %274 = vadd.xlane.f32.xlu1 %v273_v18  ;;  %v328_v16 = vmul.f32 0.6931472, %v1799_v0  ;;  %v314_v18 = vsub.f32 1.0, %v2271_v24 }
  0x47   :  { %271 = vadd.xlane.f32.xlu0 %v270_v19  ;;  %v1805_v19 = vpop.eup %1804 }
  0x48   :  { %v1807_v12 = vpop.eup %1806  ;;  %1810 = vlog2.f32 %v314_v18  ;;  %v334_v24 = vmul.f32 0.6931472, %v1805_v19  ;;  %v83_v18 = vld [vmem:[%s3542_s2 + $0x70] sm:$0xff]  ;;  %v84_v19 = vld [vmem:[%s3542_s2 + $0x78] sm:$0xff] }
  0x49   :  { %v1809_v27 = vpop.eup %1808  ;;  %1812 = vlog2.f32 %v315_v21 }
  0x4a   :  { %1814 = vlog2.f32 %v313_v22  ;;  %v336_v34 = vmul.f32 0.6931472, %v1809_v27  ;;  %v82_v27 = vld [vmem:[%s3542_s2 + $0x68] sm:$0xff] }
  0x4b   :  { %1816 = vlog2.f32 %v316_v35  ;;  %v80_v35 = vld [vmem:[%s3542_s2 + $0x58] sm:$0xff] }
  0x4c   :  { %v2338_v39 = vmax.f32 %v336_v34, -100.0  ;;  %1818 = vlog2.f32 %v317_v36  ;;  %v74_v36 = vld [vmem:[%s3542_s2 + $0x28] sm:$0xff] }
  0x4e   :  { %286 = vadd.xlane.f32.xlu2 %v285_v28  ;;  %283 = vadd.xlane.f32.xlu1 %v282_v29  ;;  %v2326_v28 = vmax.f32 %v328_v16, -100.0  ;;  %v338_v29 = vmul.f32 0.6931472, %v1807_v12  ;;  %v1811_v38 = vpop.eup %1810  ;;  %v391_v31 = vsel %vm190_vm0, %v2338_v39, 0.0 }
  0x4f   :  { %280 = vadd.xlane.f32.xlu0 %v279_v30  ;;  %v385_v30 = vsel %vm190_vm0, %v2322_v23, 0.0  ;;  %v1813_v40 = vpop.eup %1812 }
  0x50   :  { %v379_v20 = vsel %vm190_vm0, %v2326_v28, 0.0  ;;  %v2336_v37 = vmax.f32 %v338_v29, -100.0  ;;  %v344_v47 = vmul.f32 0.6931472, %v1813_v40  ;;  %v81_v29 = vld [vmem:[%s3542_s2 + $0x60] sm:$0xff] }
  0x52   :  { %v394_v46 = vsel %vm190_vm0, %v2336_v37, 0.0  ;;  %v2348_v52 = vmax.f32 %v344_v47, -100.0  ;;  %v69_v47 = vld [vmem:[%s3542_s2] sm:$0xff] }
  0x56   :  { %295 = vadd.xlane.f32.xlu2 %v294_v41  ;;  %292 = vadd.xlane.f32.xlu1 %v291_v45  ;;  %v2340_v41 = vmax.f32 %v334_v24, -100.0  ;;  %v1815_v45 = vpop.eup %1814  ;;  %v79_v24 = vld [vmem:[%s3542_s2 + $0x50] sm:$0xff] }
  0x57   :  { %289 = vadd.xlane.f32.xlu0 %v288_v48  ;;  %v342_v48 = vmul.f32 0.6931472, %v1811_v38  ;;  %v340_v33 = vmul.f32 0.6931472, %v1815_v45  ;;  %v1817_v50 = vpop.eup %1816 }
  0x58   :  { %v388_v44 = vsel %vm190_vm0, %v2340_v41, 0.0  ;;  %v1819_v55 = vpop.eup %1818  ;;  %v346_v61 = vmul.f32 0.6931472, %v1817_v50  ;;  %v73_v50 = vld [vmem:[%s3542_s2 + $0x20] sm:$0xff] }
  0x59   :  { %v2350_v54 = vmax.f32 %v342_v48, -100.0  ;;  %v2352_v56 = vmax.f32 %v340_v33, -100.0  ;;  %v348_v59 = vmul.f32 0.6931472, %v1819_v55  ;;  %v101_v55 = vld [vmem:[%s3544_s4] sm:$0xff] }
  0x5a   :  { %v2362_v53 = vmax.f32 %v346_v61, -100.0  ;;  %v72_v61 = vld [vmem:[%s3542_s2 + $0x18] sm:$0xff] }
  0x5b   :  { %v397_v60 = vsel %vm190_vm0, %v2352_v56, 0.0 }
  0x5c   :  { %v406_v4 = vsel %vm190_vm0, %v2362_v53, 0.0 }
  0x5e   :  { %368 = vadd.xlane.f32.xlu2 %v367_v57  ;;  %301 = vadd.xlane.f32.xlu1 %v300_v58  ;;  %v403_v57 = vsel %vm190_vm0, %v2348_v52, 0.0  ;;  %v400_v58 = vsel %vm190_vm0, %v2350_v54, 0.0 }
  0x5f   :  { %298 = vadd.xlane.f32.xlu0 %v297_v62  ;;  %v2360_v62 = vmax.f32 %v348_v59, -100.0 }
  0x61   :  { %v409_v1 = vsel %vm190_vm0, %v2360_v62, 0.0 }
  0x66   :  { %377 = vadd.xlane.f32.xlu2 %v376_v9  ;;  %374 = vadd.xlane.f32.xlu1 %v373_v5 }
  0x67   :  { %371 = vadd.xlane.f32.xlu0 %v370_v15 }
  0x6e   :  { %386 = vadd.xlane.f32.xlu2 %v385_v30  ;;  %383 = vadd.xlane.f32.xlu1 %v382_v32  ;;  %v75_v30 = vld [vmem:[%s3542_s2 + $0x30] sm:$0xff] }
  0x6f   :  { %380 = vadd.xlane.f32.xlu0 %v379_v20 }
  0x76   :  { %395 = vadd.xlane.f32.xlu2 %v394_v46  ;;  %392 = vadd.xlane.f32.xlu1 %v391_v31  ;;  %v77_v46 = vld [vmem:[%s3542_s2 + $0x40] sm:$0xff]  ;;  %v78_v31 = vld [vmem:[%s3542_s2 + $0x48] sm:$0xff] }
  0x77   :  { %389 = vadd.xlane.f32.xlu0 %v388_v44 }
  0x7e   :  { %404 = vadd.xlane.f32.xlu2 %v403_v57  ;;  %401 = vadd.xlane.f32.xlu1 %v400_v58 }
  0x7f   :  { %398 = vadd.xlane.f32.xlu0 %v397_v60  ;;  %v71_v60 = vld [vmem:[%s3542_s2 + $0x10] sm:$0xff] }
  0x81   :  { %v2364_v63 = vpop.xlane.xlu2 %204  ;;  %v2366_v0 = vpop.xlane.xlu1 %198 }
  0x82   :  { %v2368_v42 = vpop.xlane.xlu0 %192  ;;  %vm623_vm4 = vcmp.lt.f32.partialorder %v2070_v8, %v2366_v0  ;;  %vm625_vm6 = vcmp.lt.f32.partialorder %v2070_v8, %v2364_v63 }
  0x83   :  { %vm621_vm1 = vcmp.lt.f32.partialorder %v2070_v8, %v2368_v42 }
  0x86   :  { %410 = vadd.xlane.f32.xlu1 %v409_v1  ;;  %v103_v1 = vld [vmem:[%s3544_s4 + $0x10] sm:$0xff] }
  0x87   :  { %407 = vadd.xlane.f32.xlu0 %v406_v4 }
  0x89   :  { %v2374_v9 = vpop.xlane.xlu2 %207  ;;  %v2376_v5 = vpop.xlane.xlu1 %201 }
  0x8a   :  { %v2378_v11 = vpop.xlane.xlu0 %195  ;;  %vm624_vm5 = vcmp.lt.f32.partialorder %v2070_v8, %v2376_v5  ;;  %vm626_vm7 = vcmp.lt.f32.partialorder %v2070_v8, %v2374_v9 }
  0x8b   :  { %vm622_vm2 = vcmp.lt.f32.partialorder %v2070_v8, %v2378_v11 }
  0x91   :  { %v2380_v14 = vpop.xlane.xlu2 %216  ;;  %v2382_v15 = vpop.xlane.xlu1 %213 }
  0x92   :  { %v2384_v16 = vpop.xlane.xlu0 %210 }
  0x93   :  { %vm627_vm3 = vcmp.lt.f32.partialorder %v2070_v8, %v2384_v16 }
  0x96   :  { %1076 = vperm.xlu2 %1785, %v83_v18  }
  0x99   :  { %v2392_v21 = vpop.xlane.xlu2 %225  ;;  %v2394_v12 = vpop.xlane.xlu1 %222 }
  0x9a   :  { %v2396_v22 = vpop.xlane.xlu0 %219 }
  0x9b   :  { %1081 = vperm.xlu0 %1786, %v84_v19   ;;  %v70_v19 = vld [vmem:[%s3542_s2 + $0x8] sm:$0xff] }
  0x9e   :  { %1071 = vperm.xlu2 %1785, %v82_v27  }
  0x9f   :  { %1066 = vperm.xlu1 %1787, %v81_v29   ;;  %v105_v29 = vld [vmem:[%s3544_s4 + $0x20] sm:$0xff] }
  0xa1   :  { %v2407_v32 = vpop.xlane.xlu2 %234  ;;  %v2409_v34 = vpop.xlane.xlu1 %231 }
  0xa2   :  { %v2411_v20 = vpop.xlane.xlu0 %228 }
  0xa3   :  { %1036 = vperm.xlu0 %1786, %v75_v30  }
  0xa6   :  { %1056 = vperm.xlu2 %1785, %v79_v24  }
  0xa7   :  { %1061 = vperm.xlu1 %1787, %v80_v35  }
  0xa9   :  { %v2422_v38 = vpop.xlane.xlu2 %259  ;;  %v2424_v40 = vpop.xlane.xlu1 %256 }
  0xaa   :  { %v2426_v45 = vpop.xlane.xlu0 %237 }
  0xab   :  { %1031 = vperm.xlu0 %1786, %v74_v36   ;;  %v107_v36 = vld [vmem:[%s3544_s4 + $0x30] sm:$0xff] }
  0xae   :  { %1046 = vperm.xlu2 %1785, %v77_v46  }
  0xaf   :  { %1051 = vperm.xlu1 %1787, %v78_v31  }
  0xb1   :  { %v2437_v48 = vpop.xlane.xlu2 %268  ;;  %v2439_v44 = vpop.xlane.xlu1 %265 }
  0xb2   :  { %v2441_v33 = vpop.xlane.xlu0 %262 }
  0xb3   :  { %1006 = vperm.xlu0 %1786, %v69_v47   ;;  %v318_v47 = vsub.f32 1.0, %v2287_v43 }
  0xb5   :  { %1820 = vlog2.f32 %v318_v47 }
  0xb6   :  { %1041 = vperm.xlu2 %1785, %v76_v49  }
  0xb7   :  { %1026 = vperm.xlu1 %1787, %v73_v50   ;;  %v109_v50 = vld [vmem:[%s3544_s4 + $0x40] sm:$0xff] }
  0xb9   :  { %v2452_v57 = vpop.xlane.xlu2 %277  ;;  %v2454_v58 = vpop.xlane.xlu1 %274 }
  0xba   :  { %3564 = vst [vmem:[#allocation14_spill] sm:$0xff] %v2452_v57  ;;  %v2456_v59 = vpop.xlane.xlu0 %271 }
  0xbb   :  { %3565 = vst [vmem:[#allocation15_spill] sm:$0xff] %v2454_v58  ;;  %1161 = vperm.xlu0 %1786, %v101_v55  }
  0xbc   :  { %3566 = vst [vmem:[#allocation16_spill] sm:$0xff] %v2456_v59 }
  0xbe   :  { %1016 = vperm.xlu2 %1785, %v71_v60  }
  0xbf   :  { %1021 = vperm.xlu1 %1787, %v72_v61   ;;  %v1821_v61 = vpop.eup %1820 }
  0xc1   :  { %v2467_v4 = vpop.xlane.xlu2 %286  ;;  %v2474_v27 = vpop.xlane.xlu1 %283 }
  0xc2   :  { %3567 = vst [vmem:[#allocation17_spill] sm:$0xff] %v2467_v4  ;;  %v2469_v18 = vpop.xlane.xlu0 %280 }
  0xc3   :  { %3568 = vst [vmem:[#allocation18_spill] sm:$0xff] %v2469_v18  ;;  %1171 = vperm.xlu0 %1786, %v103_v1   ;;  %v110_v1 = vld [vmem:[%s3544_s4 + $0x48] sm:$0xff]  ;;  %v3589_v18 = vmov 1.0|1.0  }
  0xc4   :  { %3569 = vst [vmem:[#allocation19_spill] sm:$0xff] %v2474_v27 }
  0xc6   :  { %1011 = vperm.xlu2 %1785, %v70_v19   ;;  %v350_v19 = vmul.f32 0.6931472, %v1821_v61 }
  0xc9   :  { %v2479_v30 = vpop.xlane.xlu2 %295  ;;  %v2483_v35 = vpop.xlane.xlu1 %292 }
  0xca   :  { %3570 = vst [vmem:[#allocation20_spill] sm:$0xff] %v2479_v30  ;;  %v2481_v24 = vpop.xlane.xlu0 %289 }
  0xcb   :  { %3571 = vst [vmem:[#allocation21_spill] sm:$0xff] %v2481_v24  ;;  %1181 = vperm.xlu0 %1786, %v105_v29  }
  0xcc   :  { %3572 = vst [vmem:[#allocation22_spill] sm:$0xff] %v2483_v35 }
  0xd1   :  { %v2488_v46 = vpop.xlane.xlu2 %368  ;;  %v2493_v49 = vpop.xlane.xlu1 %301 }
  0xd2   :  { %v2490_v31 = vpop.xlane.xlu0 %298  ;;  %3574 = vst [vmem:[#allocation24_spill] sm:$0xff] %v2493_v49 }
  0xd3   :  { %3573 = vst [vmem:[#allocation23_spill] sm:$0xff] %v2490_v31  ;;  %1191 = vperm.xlu0 %1786, %v107_v36   ;;  %v2511_v36 = vmax.f32 %v350_v19, -100.0  ;;  %v3554_v31 = vmov 0.0  }
  0xd4   :  { %v1673_v61 = vsel %vm621_vm1, 1.0, %v3554_v31  ;;  %v1674_v49 = vsel %vm622_vm2, 1.0, %v3554_v31  ;;  %v1679_v35 = vsel %vm627_vm3, 1.0, %v3554_v31  ;;  %v1675_v16 = vsel %vm623_vm4, 1.0, %v3554_v31  ;;  %v113_v31 = vld [vmem:[%s3544_s4 + $0x60] sm:$0xff] }
  0xd5   :  { %v669_v19 = vmul.f32 %v1673_v61, %v2294_v51  ;;  %v670_v11 = vmul.f32 %v1674_v49, %v2311_v10  ;;  %v112_v61 = vld [vmem:[%s3544_s4 + $0x58] sm:$0xff]  ;;  %v675_v0 = vmul.f32 %v1679_v35, %v2322_v23  ;;  %v671_v49 = vmul.f32 %v1675_v16, %v2309_v3 }
  0xd6   :  { %vm628_vm2 = vcmp.lt.f32.partialorder %v2070_v8, %v2382_v15  ;;  %v108_v15 = vld [vmem:[%s3544_s4 + $0x38] sm:$0xff] }
  0xd7   :  { %v685_v24 = vsel %vm190_vm0, %v669_v19, 0.0 }
  0xd9   :  { %v2498_v55 = vpop.xlane.xlu2 %377  ;;  %v2507_v29 = vpop.xlane.xlu1 %374 }
  0xda   :  { %3575 = vst [vmem:[#allocation25_spill] sm:$0xff] %v2498_v55  ;;  %v2500_v60 = vpop.xlane.xlu0 %371  ;;  %v416_v55 = vmul.f32 %v2311_v10, %v2094_v17  ;;  %v2753_v17 = vld [vmem:[%s3549_s9] ss:$0 sm:$0xff] }
  0xdb   :  { %1201 = vperm.xlu0 %1786, %v109_v50   ;;  %3577 = vst [vmem:[#allocation27_spill] sm:$0xff] %v2507_v29  ;;  %v412_v50 = vsel %vm190_vm0, %v2511_v36, 0.0 }
  0xe1   :  { %v2505_v43 = vpop.xlane.xlu2 %386  ;;  %v2527_v30 = vpop.xlane.xlu1 %383 }
  0xe2   :  { %3576 = vst [vmem:[#allocation26_spill] sm:$0xff] %v2505_v43  ;;  %v2513_v47 = vpop.xlane.xlu0 %380 }
  0xe3   :  { %1206 = vperm.xlu0 %1786, %v110_v1   ;;  %3578 = vst [vmem:[#allocation28_spill] sm:$0xff] %v2513_v47  ;;  %v111_v1 = vld [vmem:[%s3544_s4 + $0x50] sm:$0xff] }
  0xe4   :  { %3580 = vst [vmem:[#allocation30_spill] sm:$0xff] %v2527_v30 }
  0xe9   :  { %v2524_v42 = vpop.xlane.xlu2 %395  ;;  %413 = vadd.xlane.f32.xlu1 %v412_v50  ;;  %v688_v50 = vsel %vm190_vm0, %v670_v11, 0.0  ;;  %v2547_v19 = vpop.xlane.xlu1 %392  ;;  %v691_v11 = vsel %vm190_vm0, %v671_v49, 0.0  ;;  %v114_v49 = vld [vmem:[%s3544_s4 + $0x68] sm:$0xff] }
  0xea   :  { %3579 = vst [vmem:[#allocation29_spill] sm:$0xff] %v2524_v42  ;;  %v2536_v42 = vpop.xlane.xlu0 %389 }
  0xeb   :  { %1211 = vperm.xlu0 %1786, %v111_v1   ;;  %3581 = vst [vmem:[#allocation31_spill] sm:$0xff] %v2536_v42 }
  0xec   :  { %3583 = vst [vmem:[#allocation33_spill] sm:$0xff] %v2547_v19 }
  0xef   :  { %686 = vadd.xlane.f32.xlu2 %v685_v24  ;;  %v703_v24 = vsel %vm190_vm0, %v675_v0, 0.0 }
  0xf1   :  { %v2543_v1 = vpop.xlane.xlu2 %404  ;;  %689 = vadd.xlane.f32.xlu1 %v688_v50  ;;  %v3584_v50 = vmov 0.0   ;;  %v2564_v5 = vpop.xlane.xlu1 %401 }
  0xf2   :  { %3582 = vst [vmem:[#allocation32_spill] sm:$0xff] %v2543_v1  ;;  %v1676_v1 = vsel %vm624_vm5, 1.0, %v3584_v50 }
  0xf3   :  { %1216 = vperm.xlu0 %1786, %v112_v61   ;;  %v2559_v61 = vpop.xlane.xlu0 %398  ;;  %v672_v16 = vmul.f32 %v1676_v1, %v2307_v2  ;;  %3586 = vst [vmem:[#allocation35_spill] sm:$0xff] %v2564_v5 }
  0xf4   :  { %3585 = vst [vmem:[#allocation34_spill] sm:$0xff] %v2559_v61 }
  0xf5   :  { %v694_v0 = vsel %vm190_vm0, %v672_v16, 0.0 }
  0xf7   :  { %704 = vadd.xlane.f32.xlu2 %v703_v24  ;;  %v1677_v24 = vsel %vm625_vm6, 1.0, %v3584_v50 }
  0xf8   :  { %v673_v1 = vmul.f32 %v1677_v24, %v2326_v28 }
  0xf9   :  { %v2557_v35 = vpop.permute.xlu2 %1076  ;;  %692 = vadd.xlane.f32.xlu1 %v691_v11  ;;  %v1678_v11 = vsel %vm626_vm7, 1.0, %v3584_v50  ;;  %v2580_v16 = vpop.xlane.xlu1 %410 }
  0xfa   :  { %v697_v63 = vsel %vm190_vm0, %v673_v1, 0.0  ;;  %3588 = vst [vmem:[#allocation37_spill] sm:$0xff] %v2580_v16  ;;  %v674_v9 = vmul.f32 %v1678_v11, %v2324_v25  ;;  %v3556_v1 = vmov 1.0|1.0  }
  0xfb   :  { %1221 = vperm.xlu0 %1786, %v113_v31   ;;  %v2573_v31 = vpop.xlane.xlu0 %407 }
  0xfc   :  { %3587 = vst [vmem:[#allocation36_spill] sm:$0xff] %v2573_v31 }
 0x101   :  { %v2571_v19 = vpop.permute.xlu2 %1071  ;;  %695 = vadd.xlane.f32.xlu1 %v694_v0  ;;  %v2587_v0 = vld [vmem:[%s3547_s7] ss:$0 sm:$0xff] }
 0x102   :  { %vm3560_vm8 = vcmp.le.f32.partialorder %v2587_v0, %v2557_v35  ;;  %vm3559_vm11 = vcmp.le.f32.partialorder %v2587_v0, %v2571_v19 }
 0x103   :  { %1226 = vperm.xlu0 %1786, %v114_v49   ;;  %v102_v49 = vld [vmem:[%s3544_s4 + $0x8] sm:$0xff] }
 0x109   :  { %v2582_v5 = vpop.permute.xlu2 %1056  ;;  %698 = vadd.xlane.f32.xlu1 %v697_v63  ;;  %v700_v63 = vsel %vm190_vm0, %v674_v9, 0.0  ;;  %v104_v9 = vld [vmem:[%s3544_s4 + $0x18] sm:$0xff] }
 0x10a   :  { %vm3563_vm14 = vcmp.le.f32.partialorder %v2587_v0, %v2582_v5 }
 0x10d   :  { %v2593_v24 = vpop.permute.xlu0 %1081 }
 0x10e   :  { %vm3558_vm9 = vcmp.le.f32.partialorder %v2587_v0, %v2593_v24 }
 0x10f   :  { %vm1705_vm10 = vmpackc.low %vm3558_vm9, %vm3560_vm8  ;;  %1166 = vperm.xlu2 %1785, %v102_v49  }
 0x110   :  { %1706 = vmatpush.bf16.msk.msra.mxu0 %vm1705_vm10, %v3556_v1 }
 0x111   :  { %v2607_v11 = vpop.permute.xlu1 %1066  ;;  %701 = vadd.xlane.f32.xlu1 %v700_v63  ;;  %v2619_v49 = vpop.permute.xlu2 %1046 }
 0x112   :  { %vm3561_vm12 = vcmp.le.f32.partialorder %v2587_v0, %v2607_v11  ;;  %vm1092_vm3 = vcmp.le.f32.partialorder %v2587_v0, %v2619_v49 }
 0x113   :  { %vm1707_vm13 = vmpackc.low %vm3559_vm11, %vm3561_vm12 }
 0x114   :  { %1708 = vmatpush.bf16.msk.msra.mxu0 %vm1707_vm13, %v3556_v1  ;;  %vm631_vm13 = vcmp.lt.f32.partialorder %v2070_v8, %v2394_v12  ;;  %v116_v12 = vld [vmem:[%s3544_s4 + $0x78] sm:$0xff] }
 0x115   :  { %v2643_v31 = vpop.permute.xlu0 %1036 }
 0x116   :  { %vm1090_vm6 = vcmp.le.f32.partialorder %v2587_v0, %v2643_v31 }
 0x117   :  { %1176 = vperm.xlu2 %1785, %v104_v9   ;;  %v106_v9 = vld [vmem:[%s3544_s4 + $0x28] sm:$0xff] }
 0x119   :  { %v2625_v63 = vpop.permute.xlu1 %1061  ;;  %v2641_v16 = vpop.permute.xlu2 %1041 }
 0x11a   :  { %vm3562_vm15 = vcmp.le.f32.partialorder %v2587_v0, %v2625_v63  ;;  %vm1091_vm7 = vcmp.le.f32.partialorder %v2587_v0, %v2641_v16  ;;  %v1936_v16 = vld [vmem:[%s3541_s1 + $0x58] sm:$0xff] }
 0x11b   :  { %vm1709_vm1 = vmpackc.low %vm3562_vm15, %vm3563_vm14  ;;  %v426_v49 = vmul.f32 %v1936_v16, %v2350_v54 }
 0x11c   :  { %1710 = vmatpush.bf16.msk.msra.mxu0 %vm1709_vm1, %v3556_v1  ;;  %vm1713_vm10 = vmpackc.low %vm1091_vm7, %vm1090_vm6 }
 0x11d   :  { %v2681_v4 = vpop.permute.xlu0 %1031 }
 0x11e   :  { %vm1089_vm1 = vcmp.le.f32.partialorder %v2587_v0, %v2681_v4  ;;  %v1933_v4 = vld [vmem:[%s3541_s1 + $0x40] sm:$0xff] }
 0x11f   :  { %1186 = vperm.xlu2 %1785, %v106_v9   ;;  %v1680_v9 = vsel %vm628_vm2, 1.0, %v3584_v50 }
 0x120   :  { %v676_v27 = vmul.f32 %v1680_v9, %v2340_v41  ;;  %v1683_v9 = vsel %vm631_vm13, 1.0, %v3584_v50 }
 0x121   :  { %v2645_v61 = vpop.permute.xlu1 %1051  ;;  %v2674_v42 = vpop.permute.xlu2 %1016 }
 0x122   :  { %vm1093_vm4 = vcmp.le.f32.partialorder %v2587_v0, %v2645_v61  ;;  %v1938_v61 = vld [vmem:[%s3541_s1 + $0x68] sm:$0xff] }
 0x123   :  { %vm1711_vm5 = vmpackc.low %vm1093_vm4, %vm1092_vm3 }
 0x124   :  { %1712 = vmatpush.bf16.msk.msra.mxu0 %vm1711_vm5, %v3556_v1  ;;  %v115_v1 = vld [vmem:[%s3544_s4 + $0x70] sm:$0xff] }
 0x127   :  { %1196 = vperm.xlu2 %1785, %v108_v15   ;;  %v706_v15 = vsel %vm190_vm0, %v676_v27, 0.0  ;;  %v1007_v27 = vpop.permute.xlu0 %1006 }
 0x128   :  { %1714 = vmatpush.bf16.msk.msra.mxu0 %vm1713_vm10, %v3589_v18  ;;  %vm632_vm10 = vcmp.lt.f32.partialorder %v2070_v8, %v2392_v21  ;;  %vm1084_vm8 = vcmp.le.f32.partialorder %v2587_v0, %v1007_v27  ;;  %v418_v27 = vmul.f32 %v2307_v2, %v2086_v13  ;;  %v421_v2 = vmul.f32 %v2322_v23, %v2118_v26 }
 0x129   :  { %v2683_v30 = vpop.permute.xlu1 %1026  ;;  %v2704_v43 = vpop.permute.xlu2 %1011 }
 0x12a   :  { %vm1088_vm2 = vcmp.le.f32.partialorder %v2587_v0, %v2683_v30  ;;  %1231 = vperm.xlu1 %1787, %v115_v1   ;;  %v679_v1 = vmul.f32 %v1683_v9, %v2352_v56  ;;  %vm1085_vm11 = vcmp.le.f32.partialorder %v2587_v0, %v2704_v43  ;;  %v423_v30 = vmul.f32 %v1933_v4, %v2338_v39 }
 0x12b   :  { %vm1715_vm5 = vmpackc.low %vm1089_vm1, %vm1088_vm2 }
 0x12c   :  { %1716 = vmatpush.bf16.msk.msra.mxu0 %vm1715_vm5, %v3589_v18  ;;  %vm1086_vm5 = vcmp.le.f32.partialorder %v2587_v0, %v2674_v42  ;;  %v715_v21 = vsel %vm190_vm0, %v679_v1, 0.0  ;;  %vm1719_vm12 = vmpackc.low %vm1085_vm11, %vm1084_vm8  ;;  %v1140_v42 = vld [vmem:[%s3546_s6] sm:$0xf] }
 0x12d   :  { %707 = vadd.xlane.f32.xlu0 %v706_v15  ;;  %v1684_v15 = vsel %vm632_vm10, 1.0, %v3584_v50  ;;  %vm635_vm10 = vcmp.lt.f32.partialorder %v2070_v8, %v2407_v32 }
 0x12f   :  { %1236 = vperm.xlu2 %1785, %v116_v12   ;;  %v680_v12 = vmul.f32 %v1684_v15, %v2350_v54  ;;  %v464_v54 = vsel %vm190_vm0, %v426_v49, 0.0 }
 0x131   :  { %v2706_v57 = vpop.permute.xlu1 %1021  ;;  %v718_v9 = vsel %vm190_vm0, %v680_v12, 0.0  ;;  %v1687_v12 = vsel %vm635_vm10, 1.0, %v3584_v50  ;;  %vm634_vm10 = vcmp.lt.f32.partialorder %v2070_v8, %v2409_v34 }
 0x132   :  { %vm1087_vm9 = vcmp.le.f32.partialorder %v2587_v0, %v2706_v57  ;;  %v683_v32 = vmul.f32 %v1687_v12, %v2360_v62 }
 0x133   :  { %vm1717_vm13 = vmpackc.low %vm1087_vm9, %vm1086_vm5 }
 0x134   :  { %1718 = vmatpush.bf16.msk.msra.mxu0 %vm1717_vm13, %v3589_v18  ;;  %vm633_vm13 = vcmp.lt.f32.partialorder %v2070_v8, %v2411_v20  ;;  %v434_v20 = vsel %vm190_vm0, %v416_v55, 0.0 }
 0x135   :  { %716 = vadd.xlane.f32.xlu0 %v715_v21  ;;  %v1685_v1 = vsel %vm633_vm13, 1.0, %v3584_v50  ;;  %v1162_v21 = vpop.permute.xlu0 %1161  ;;  %vm630_vm13 = vcmp.lt.f32.partialorder %v2070_v8, %v2396_v22 }
 0x136   :  { %v681_v47 = vmul.f32 %v1685_v1, %v2348_v52  ;;  %vm1242_vm15 = vcmp.lt.f32.partialorder %v1162_v21, %v2753_v17 }
 0x138   :  { %1720 = vmatpush.bf16.msk.msra.mxu0 %vm1719_vm12, %v3589_v18  ;;  %v721_v59 = vsel %vm190_vm0, %v681_v47, 0.0  ;;  %vm629_vm12 = vcmp.lt.f32.partialorder %v2070_v8, %v2380_v14  ;;  %v1682_v14 = vsel %vm630_vm13, 1.0, %v3584_v50  ;;  %v727_v47 = vsel %vm190_vm0, %v683_v32, 0.0 }
 0x139   :  { %v1681_v15 = vsel %vm629_vm12, 1.0, %v3584_v50  ;;  %vm1290_vm12 = vcmp.le.f32.partialorder %v1162_v21, %v2753_v17  ;;  %v678_v55 = vmul.f32 %v1682_v14, %v2336_v37  ;;  %v415_v21 = vmul.f32 %v2294_v51, %v2068_v7 }
 0x13a   :  { %v677_v10 = vmul.f32 %v1681_v15, %v2338_v39  ;;  %v1737_v1 = vsel %vm1290_vm12, 1.0, %v3584_v50  ;;  %v1686_v15 = vsel %vm634_vm10, 1.0, %v3584_v50 }
 0x13b   :  { %v682_v34 = vmul.f32 %v1686_v15, %v2362_v53  ;;  %1149 = vmatmul.bf16.vlgmr.msra.gmra.mxu0 %v1140_v42 }
 0x13c   :  { %v709_v22 = vsel %vm190_vm0, %v677_v10, 0.0  ;;  %v431_v10 = vsel %vm190_vm0, %v415_v21, 0.0 }
 0x13d   :  { %719 = vadd.xlane.f32.xlu0 %v718_v9  ;;  %v1172_v18 = vpop.permute.xlu0 %1171  ;;  %v1721_v9 = vsel %vm1242_vm15, 1.0, %v3584_v50  ;;  %vm636_vm15 = vcmp.lt.f32.partialorder %v2070_v8, %v2426_v45  ;;  %v440_v45 = vsel %vm190_vm0, %v418_v27, 0.0 }
 0x13e   :  { %v1338_v12 = vadd.f32 %v1737_v1, %v1721_v9  ;;  %vm1244_vm13 = vcmp.lt.f32.partialorder %v1172_v18, %v2753_v17  ;;  %vm1292_vm14 = vcmp.le.f32.partialorder %v1172_v18, %v2753_v17  ;;  %v724_v18 = vsel %vm190_vm0, %v682_v34, 0.0 }
 0x13f   :  { %v1723_v51 = vsel %vm1244_vm13, 1.0, %v3584_v50 }
 0x140   :  { %v1354_v7 = vsel %vm1084_vm8, 0.0, %v1338_v12 }
 0x145   :  { %722 = vadd.xlane.f32.xlu0 %v721_v59  ;;  %v2760_v59 = vpop.permute.xlu0 %1181 }
 0x146   :  { %vm1294_vm12 = vcmp.le.f32.partialorder %v2760_v59, %v2753_v17 }
 0x14d   :  { %435 = vadd.xlane.f32.xlu0 %v434_v20  ;;  %v712_v20 = vsel %vm190_vm0, %v678_v55, 0.0  ;;  %v2777_v14 = vpop.permute.xlu0 %1191  ;;  %v417_v55 = vmul.f32 %v2309_v3, %v2063_v6 }
 0x14e   :  { %vm1248_vm13 = vcmp.lt.f32.partialorder %v2777_v14, %v2753_v17 }
 0x14f   :  { %v437_v9 = vsel %vm190_vm0, %v417_v55, 0.0  ;;  %v1930_v55 = vld [vmem:[%s3541_s1 + $0x20] sm:$0xff] }
 0x154   :  { %710 = vadd.xlane.f32.xlu1 %v709_v22  ;;  %v1739_v22 = vsel %vm1292_vm14, 1.0, %v3584_v50 }
 0x155   :  { %728 = vadd.xlane.f32.xlu0 %v727_v47  ;;  %v1340_v47 = vadd.f32 %v1739_v22, %v1723_v51  ;;  %v2804_v13 = vpop.permute.xlu0 %1201 }
 0x157   :  { %v1356_v6 = vsel %vm1086_vm5, 0.0, %v1340_v47  ;;  %v85_v47 = vld [vmem:[%s3543_s3] sm:$0xff]  ;;  %vm1246_vm5 = vcmp.lt.f32.partialorder %v2760_v59, %v2753_v17 }
 0x158   :  { %713 = vadd.xlane.f32.xlu2 %v712_v20  ;;  %v1688_v20 = vsel %vm636_vm15, 1.0, %v3584_v50  ;;  %vm1296_vm15 = vcmp.le.f32.partialorder %v2777_v14, %v2753_v17 }
 0x159   :  { %v684_v15 = vmul.f32 %v1688_v20, %v2511_v36  ;;  %v765_v20 = vsub.f32 1.0, %v85_v47  ;;  %v1743_v59 = vsel %vm1296_vm15, 1.0, %v3584_v50 }
 0x15c   :  { %v2779_v32 = vpop.xlane.xlu1 %413  ;;  %432 = vadd.xlane.f32.xlu1 %v431_v10  ;;  %v449_v10 = vsel %vm190_vm0, %v421_v2, 0.0 }
 0x15d   :  { %3590 = vst [vmem:[#allocation38_spill] sm:$0xff] %v2779_v32  ;;  %1370 = vadd.xlane.f32.xlu0 %v1354_v7  ;;  %v730_v7 = vsel %vm190_vm0, %v684_v15, 0.0  ;;  %v2826_v27 = vpop.permute.xlu0 %1206 }
 0x160   :  { %725 = vadd.xlane.f32.xlu2 %v724_v18  ;;  %v419_v18 = vmul.f32 %v1930_v55, %v2326_v28 }
 0x162   :  { %v2793_v1 = vpop.xlane.xlu2 %686 }
 0x163   :  { %v733_v21 = vmul.f32 1.442695, %v2793_v1 }
 0x164   :  { %438 = vadd.xlane.f32.xlu1 %v437_v9  ;;  %v2800_v3 = vpop.xlane.xlu1 %689 }
 0x165   :  { %1822 = vpow2.f32 %v733_v21  ;;  %1374 = vadd.xlane.f32.xlu0 %v1356_v6  ;;  %v735_v8 = vmul.f32 1.442695, %v2800_v3  ;;  %v86_v6 = vld [vmem:[%s3543_s3 + $0x8] sm:$0xff]  ;;  %v782_v47 = vmax.f32 %v2800_v3, -100.0  ;;  %v2852_v3 = vpop.permute.xlu0 %1211 }
 0x166   :  { %v766_v15 = vsub.f32 1.0, %v86_v6 }
 0x167   :  { %1824 = vpow2.f32 %v735_v8  ;;  %v443_v8 = vsel %vm190_vm0, %v419_v18, 0.0 }
 0x168   :  { %441 = vadd.xlane.f32.xlu2 %v440_v45  ;;  %v813_v45 = vsub.f32 1.0, %v765_v20  ;;  %v798_v43 = vmul.f32 %v782_v47, %v766_v15 }
 0x16a   :  { %v2812_v12 = vpop.xlane.xlu2 %704 }
 0x16b   :  { %v1823_v34 = vpop.eup %1822  ;;  %v745_v21 = vmul.f32 1.442695, %v2812_v12 }
 0x16c   :  { %v829_v51 = vsub.f32 1.0, %v1823_v34  ;;  %731 = vadd.xlane.f32.xlu1 %v730_v7  ;;  %v2816_v22 = vpop.xlane.xlu1 %692 }
 0x16d   :  { %v1825_v26 = vpop.eup %1824  ;;  %450 = vadd.xlane.f32.xlu0 %v449_v10  ;;  %v737_v23 = vmul.f32 1.442695, %v2816_v22 }
 0x16e   :  { %1826 = vlog2.f32 %v829_v51  ;;  %v830_v9 = vsub.f32 1.0, %v1825_v26  ;;  %v781_v51 = vmax.f32 %v2793_v1, -100.0  ;;  %v87_v1 = vld [vmem:[%s3543_s3 + $0x10] sm:$0xff] }
 0x16f   :  { %1828 = vpow2.f32 %v737_v23 }
 0x170   :  { %1830 = vlog2.f32 %v830_v9  ;;  %v797_v32 = vmul.f32 %v781_v51, %v765_v20  ;;  %v1931_v20 = vld [vmem:[%s3541_s1 + $0x28] sm:$0xff]  ;;  %v767_v51 = vsub.f32 1.0, %v87_v1 }
 0x171   :  { %1832 = vpow2.f32 %v745_v21  ;;  %v814_v21 = vsub.f32 1.0, %v766_v15  ;;  %v2874_v1 = vld [vmem:[%s3545_s5 + $0x8] sm:$0xff] }
 0x172   :  { %v1167_v28 = vpop.permute.xlu2 %1166 }
 0x173   :  { %vm1243_vm8 = vcmp.lt.f32.partialorder %v1167_v28, %v2753_v17  ;;  %vm1291_vm14 = vcmp.le.f32.partialorder %v1167_v28, %v2753_v17 }
 0x174   :  { %v1827_v2 = vpop.eup %1826  ;;  %v1722_v42 = vsel %vm1243_vm8, 1.0, %v3584_v50  ;;  %v1738_v10 = vsel %vm1291_vm14, 1.0, %v3584_v50  ;;  %444 = vadd.xlane.f32.xlu1 %v443_v8  ;;  %v2837_v34 = vpop.xlane.xlu1 %695  ;;  %vm576_vm14 = vcmask 7168  }
 0x175   :  { %v1829_v7 = vpop.eup %1828  ;;  %v846_v26 = vmul.f32 0.6931472, %v1827_v2  ;;  %v739_v23 = vmul.f32 1.442695, %v2837_v34  ;;  %v1339_v55 = vadd.f32 %v1738_v10, %v1722_v42 }
 0x176   :  { %v1831_v18 = vpop.eup %1830  ;;  %v831_v9 = vsub.f32 1.0, %v1829_v7 }
 0x177   :  { %v877_v6 = vmax.f32 %v846_v26, -100.0  ;;  %v848_v28 = vmul.f32 0.6931472, %v1831_v18  ;;  %v1355_v8 = vsel %vm1085_vm11, 0.0, %v1339_v55  ;;  %v1833_v2 = vpop.eup %1832  ;;  %v815_v55 = vsub.f32 1.0, %v767_v51 }
 0x178   :  { %1834 = vlog2.f32 %v831_v9  ;;  %1372 = vadd.xlane.f32.xlu2 %v1355_v8  ;;  %v783_v18 = vmax.f32 %v2816_v22, -100.0  ;;  %v1741_v22 = vsel %vm1294_vm12, 1.0, %v3584_v50  ;;  %vm1251_vm12 = vcmp.lt.f32.partialorder %v2826_v27, %v2753_v17 }
 0x179   :  { %v893_v29 = vmul.f32 %v877_v6, %v813_v45  ;;  %v878_v58 = vmax.f32 %v848_v28, -100.0  ;;  %1836 = vpow2.f32 %v739_v23  ;;  %v420_v45 = vmul.f32 %v1931_v20, %v2324_v25  ;;  %v2890_v20 = vld [vmem:[%s3545_s5] sm:$0xff] }
 0x17a   :  { %v1177_v42 = vpop.permute.xlu2 %1176  ;;  %v799_v57 = vmul.f32 %v783_v18, %v767_v51  ;;  %v2913_v51 = vld [vmem:[%s3543_s3 + $0x18] sm:$0xff] }
 0x17b   :  { %v909_v10 = vadd.f32 %v893_v29, %v797_v32  ;;  %v894_v7 = vmul.f32 %v878_v58, %v814_v21  ;;  %vm1245_vm11 = vcmp.lt.f32.partialorder %v1177_v42, %v2753_v17  ;;  %vm1293_vm10 = vcmp.le.f32.partialorder %v1177_v42, %v2753_v17 }
 0x17c   :  { %v1724_v26 = vsel %vm1245_vm11, 1.0, %v3584_v50  ;;  %v1740_v15 = vsel %vm1293_vm10, 1.0, %v3584_v50  ;;  %v2864_v23 = vpop.xlane.xlu1 %698  ;;  %v835_v29 = vsub.f32 1.0, %v1833_v2  ;;  %v446_v47 = vsel %vm190_vm0, %v420_v45, 0.0 }
 0x17d   :  { %v910_v25 = vadd.f32 %v894_v7, %v798_v43  ;;  %v741_v58 = vmul.f32 1.442695, %v2864_v23  ;;  %v1341_v9 = vadd.f32 %v1740_v15, %v1724_v26  ;;  %v925_v21 = vsub.f32 0.0, %v909_v10  ;;  %v1932_v26 = vld [vmem:[%s3541_s1 + $0x38] sm:$0xff] }
 0x17e   :  { %v1835_v32 = vpop.eup %1834  ;;  %v1725_v2 = vsel %vm1246_vm5, 1.0, %v3584_v50  ;;  %v1727_v45 = vsel %vm1248_vm13, 1.0, %v3584_v50  ;;  %v422_v15 = vmul.f32 %v1932_v26, %v2340_v41  ;;  %vm1299_vm11 = vcmp.le.f32.partialorder %v2826_v27, %v2753_v17  ;;  %v1937_v27 = vld [vmem:[%s3541_s1 + $0x60] sm:$0xff] }
 0x17f   :  { %v1837_v6 = vpop.eup %1836  ;;  %v926_v28 = vsub.f32 0.0, %v910_v25  ;;  %v850_v8 = vmul.f32 0.6931472, %v1835_v32  ;;  %1838 = vpow2.f32 %v741_v58  ;;  %v1357_v42 = vsel %vm1087_vm9, 0.0, %v1341_v9 }
 0x180   :  { %v832_v43 = vsub.f32 1.0, %v1837_v6  ;;  %1840 = vlog2.f32 %v835_v29  ;;  %447 = vadd.xlane.f32.xlu2 %v446_v47  ;;  %1376 = vadd.xlane.f32.xlu1 %v1357_v42  ;;  %v942_v14 = vmul.f32 %v925_v21, %v2890_v20  ;;  %v2908_v29 = vpop.permute.xlu0 %1216  ;;  %v1344_v21 = vadd.f32 %v1743_v59, %v1727_v45  ;;  %v2932_v45 = vld [vmem:[%s3543_s3 + $0x20] sm:$0xff] }
 0x181   :  { %v879_v10 = vmax.f32 %v850_v8, -100.0  ;;  %v943_v25 = vmul.f32 %v926_v28, %v2874_v1  ;;  %v452_v8 = vsel %vm190_vm0, %v422_v15, 0.0  ;;  %vm1253_vm10 = vcmp.lt.f32.partialorder %v2908_v29, %v2753_v17 }
 0x182   :  { %1842 = vlog2.f32 %v832_v43  ;;  %v1187_v7 = vpop.permute.xlu2 %1186  ;;  %vm1301_vm13 = vcmp.le.f32.partialorder %v2908_v29, %v2753_v17 }
 0x183   :  { %v895_v58 = vmul.f32 %v879_v10, %v815_v55  ;;  %vm1247_vm9 = vcmp.lt.f32.partialorder %v1187_v7, %v2753_v17  ;;  %vm1295_vm8 = vcmp.le.f32.partialorder %v1187_v7, %v2753_v17  ;;  %v1342_v55 = vadd.f32 %v1741_v22, %v1725_v2  ;;  %v2925_v10 = vld [vmem:[%s3545_s5 + $0x10] sm:$0xff] }
 0x184   :  { %v1726_v32 = vsel %vm1247_vm9, 1.0, %v3584_v50  ;;  %v1742_v41 = vsel %vm1295_vm8, 1.0, %v3584_v50  ;;  %v2917_v18 = vpop.xlane.xlu1 %701  ;;  %v959_v42 = vsel %vm576_vm14, %v943_v25, 0.0  ;;  %v768_v2 = vsub.f32 1.0, %v2913_v51 }
 0x185   :  { %v1839_v47 = vpop.eup %1838  ;;  %v911_v9 = vadd.f32 %v895_v58, %v799_v57  ;;  %v743_v6 = vmul.f32 1.442695, %v2917_v18  ;;  %v1343_v43 = vadd.f32 %v1742_v41, %v1726_v32  ;;  %v958_v22 = vsel %vm576_vm14, %v942_v14, 0.0  ;;  %v2943_v58 = vld [vmem:[%s3543_s3 + $0x30] sm:$0xff] }
 0x186   :  { %v833_v28 = vsub.f32 1.0, %v1839_v47  ;;  %v1841_v7 = vpop.eup %1840  ;;  %v1358_v59 = vsel %vm1088_vm2, 0.0, %v1342_v55  ;;  %v960_v25 = vadd.f32 %v959_v42, %v958_v22  ;;  %v816_v14 = vsub.f32 1.0, %v768_v2 }
 0x187   :  { %v927_v26 = vsub.f32 0.0, %v911_v9  ;;  %1844 = vpow2.f32 %v743_v6  ;;  %v1359_v15 = vsel %vm1089_vm1, 0.0, %v1343_v43  ;;  %v784_v32 = vmax.f32 %v2837_v34, -100.0 }
 0x188   :  { %v1843_v57 = vpop.eup %1842  ;;  %1846 = vlog2.f32 %v833_v28  ;;  %1378 = vadd.xlane.f32.xlu2 %v1358_v59  ;;  %453 = vadd.xlane.f32.xlu1 %v452_v8  ;;  %vm1250_vm2 = vcmp.lt.f32.partialorder %v2804_v13, %v2753_v17  ;;  %v1360_v55 = vsel %vm1090_vm6, 0.0, %v1344_v21  ;;  %v769_v9 = vsub.f32 1.0, %v2932_v45  ;;  %v1934_v28 = vld [vmem:[%s3541_s1 + $0x48] sm:$0xff] }
 0x189   :  { %v852_v41 = vmul.f32 0.6931472, %v1843_v57  ;;  %v944_v47 = vmul.f32 %v927_v26, %v2925_v10  ;;  %1380 = vadd.xlane.f32.xlu0 %v1359_v15  ;;  %v424_v8 = vmul.f32 %v1934_v28, %v2336_v37  ;;  %vm1298_vm1 = vcmp.le.f32.partialorder %v2804_v13, %v2753_v17  ;;  %v2969_v37 = vpop.permute.xlu0 %1221  ;;  %v2991_v13 = vld [vmem:[%s3543_s3 + $0x28] sm:$0xff] }
 0x18a   :  { %v1197_v6 = vpop.permute.xlu2 %1196  ;;  %v771_v39 = vsub.f32 1.0, %v2943_v58  ;;  %v858_v42 = vmul.f32 0.6931472, %v1841_v7  ;;  %v1729_v26 = vsel %vm1250_vm2, 1.0, %v3584_v50  ;;  %v800_v22 = vmul.f32 %v784_v32, %v768_v2 }
 0x18b   :  { %v880_v34 = vmax.f32 %v852_v41, -100.0  ;;  %v961_v43 = vsel %vm576_vm14, %v944_v47, 0.0  ;;  %v817_v59 = vsub.f32 1.0, %v769_v9  ;;  %vm1249_vm6 = vcmp.lt.f32.partialorder %v1197_v6, %v2753_v17 }
 0x18c   :  { %v962_v31 = vadd.f32 %v961_v43, %v960_v25  ;;  %vm1297_vm5 = vcmp.le.f32.partialorder %v1197_v6, %v2753_v17  ;;  %v455_v7 = vsel %vm190_vm0, %v423_v30, 0.0  ;;  %v785_v47 = vmax.f32 %v2864_v23, -100.0 }
 0x18d   :  { %v1845_v21 = vpop.eup %1844  ;;  %v896_v57 = vmul.f32 %v880_v34, %v816_v14  ;;  %v458_v28 = vsel %vm190_vm0, %v424_v8, 0.0  ;;  %v1745_v2 = vsel %vm1298_vm1, 1.0, %v3584_v50  ;;  %v819_v14 = vsub.f32 1.0, %v771_v39  ;;  %v2983_v34 = vld [vmem:[%s3545_s5 + $0x18] sm:$0xff] }
 0x18e   :  { %v1847_v15 = vpop.eup %1846  ;;  %v834_v41 = vsub.f32 1.0, %v1845_v21  ;;  %v883_v32 = vmax.f32 %v858_v42, -100.0  ;;  %v1728_v23 = vsel %vm1249_vm6, 1.0, %v3584_v50  ;;  %v1744_v43 = vsel %vm1297_vm5, 1.0, %v3584_v50  ;;  %v1935_v42 = vld [vmem:[%s3541_s1 + $0x50] sm:$0xff] }
 0x18f   :  { %v912_v25 = vadd.f32 %v896_v57, %v800_v22  ;;  %v854_v4 = vmul.f32 0.6931472, %v1847_v15  ;;  %v787_v8 = vmax.f32 %v2812_v12, -100.0  ;;  %v425_v21 = vmul.f32 %v1935_v42, %v2352_v56 }
 0x190   :  { %1848 = vlog2.f32 %v834_v41  ;;  %456 = vadd.xlane.f32.xlu2 %v455_v7  ;;  %1382 = vadd.xlane.f32.xlu1 %v1360_v55  ;;  %v801_v22 = vmul.f32 %v785_v47, %v769_v9  ;;  %v1346_v12 = vadd.f32 %v1745_v2, %v1729_v26  ;;  %v1345_v55 = vadd.f32 %v1744_v43, %v1728_v23 }
 0x191   :  { %v928_v30 = vsub.f32 0.0, %v912_v25  ;;  %v881_v6 = vmax.f32 %v854_v4, -100.0  ;;  %459 = vadd.xlane.f32.xlu0 %v458_v28  ;;  %v899_v41 = vmul.f32 %v883_v32, %v819_v14  ;;  %v770_v25 = vsub.f32 1.0, %v2991_v13  ;;  %v3006_v2 = vpop.permute.xlu0 %1226 }
 0x192   :  { %v803_v56 = vmul.f32 %v787_v8, %v771_v39  ;;  %v461_v9 = vsel %vm190_vm0, %v425_v21, 0.0  ;;  %v1362_v14 = vsel %vm1092_vm3, 0.0, %v1346_v12  ;;  %v1361_v32 = vsel %vm1091_vm7, 0.0, %v1345_v55  ;;  %v3017_v39 = vld [vmem:[%s3545_s5 + $0x20] sm:$0xff]  ;;  %v3048_v55 = vld [vmem:[%s3545_s5 + $0x28] sm:$0xff] }
 0x193   :  { %v897_v57 = vmul.f32 %v881_v6, %v817_v59  ;;  %v945_v15 = vmul.f32 %v928_v30, %v2983_v34  ;;  %v818_v30 = vsub.f32 1.0, %v770_v25  ;;  %v786_v6 = vmax.f32 %v2917_v18, -100.0 }
 0x194   :  { %v1730_v18 = vsel %vm1251_vm12, 1.0, %v3584_v50  ;;  %v915_v23 = vadd.f32 %v899_v41, %v803_v56  ;;  %v427_v21 = vmul.f32 %v1937_v27, %v2348_v52  ;;  %vm1252_vm3 = vcmp.lt.f32.partialorder %v2852_v3, %v2753_v17  ;;  %v3043_v52 = vld [vmem:[%s3545_s5 + $0x30] sm:$0xff] }
 0x195   :  { %v913_v7 = vadd.f32 %v897_v57, %v801_v22  ;;  %v963_v4 = vsel %vm576_vm14, %v945_v15, 0.0  ;;  %v802_v8 = vmul.f32 %v786_v6, %v770_v25  ;;  %vm1300_vm7 = vcmp.le.f32.partialorder %v2852_v3, %v2753_v17 }
 0x196   :  { %v1849_v28 = vpop.eup %1848  ;;  %v964_v59 = vadd.f32 %v963_v4, %v962_v31  ;;  %v1746_v31 = vsel %vm1299_vm11, 1.0, %v3584_v50  ;;  %v931_v15 = vsub.f32 0.0, %v915_v23  ;;  %v467_v3 = vsel %vm190_vm0, %v427_v21, 0.0 }
 0x197   :  { %v929_v47 = vsub.f32 0.0, %v913_v7  ;;  %v856_v26 = vmul.f32 0.6931472, %v1849_v28  ;;  %v1347_v57 = vadd.f32 %v1746_v31, %v1730_v18  ;;  %v1731_v28 = vsel %vm1252_vm3, 1.0, %v3584_v50 }
 0x198   :  { %462 = vadd.xlane.f32.xlu1 %v461_v9  ;;  %1384 = vadd.xlane.f32.xlu2 %v1361_v32  ;;  %v1747_v56 = vsel %vm1300_vm7, 1.0, %v3584_v50  ;;  %v948_v9 = vmul.f32 %v931_v15, %v3043_v52  ;;  %v1748_v6 = vsel %vm1301_vm13, 1.0, %v3584_v50  ;;  %vm1302_vm15 = vcmp.le.f32.partialorder %v2969_v37, %v2753_v17 }
 0x199   :  { %v882_v43 = vmax.f32 %v856_v26, -100.0  ;;  %1386 = vadd.xlane.f32.xlu0 %v1362_v14  ;;  %v946_v22 = vmul.f32 %v929_v47, %v3017_v39  ;;  %v1363_v4 = vsel %vm1093_vm4, 0.0, %v1347_v57  ;;  %v428_v26 = vmul.f32 %v1938_v61, %v2362_v53  ;;  %v1237_v57 = vpop.permute.xlu2 %1236 }
 0x19a   :  { %v1348_v18 = vadd.f32 %v1747_v56, %v1731_v28  ;;  %vm1254_vm4 = vcmp.lt.f32.partialorder %v2969_v37, %v2753_v17  ;;  %vm3591_vm9 = vcmp.le.f32.partialorder %v2587_v0, %v2582_v5  ;;  %vm3592_vm8 = vcmp.le.f32.partialorder %v2587_v0, %v2625_v63  ;;  %v1939_v37 = vld [vmem:[%s3541_s1 + $0x70] sm:$0xff]  ;;  %v1940_v5 = vld [vmem:[%s3541_s1 + $0x78] sm:$0xff] }
 0x19b   :  { %v898_v42 = vmul.f32 %v882_v43, %v818_v30  ;;  %v965_v7 = vsel %vm576_vm14, %v946_v22, 0.0  ;;  %v1732_v30 = vsel %vm1253_vm10, 1.0, %v3584_v50  ;;  %v969_v43 = vsel %vm576_vm14, %v948_v9, 0.0 }
 0x19c   :  { %v966_v14 = vadd.f32 %v965_v7, %v964_v59  ;;  %v1349_v23 = vadd.f32 %v1748_v6, %v1732_v30  ;;  %v470_v29 = vsel %vm190_vm0, %v428_v26, 0.0  ;;  %v1364_v53 = vsel %vm3591_vm9, 0.0, %v1348_v18  ;;  %v1232_v21 = vpop.permute.xlu1 %1231 }
 0x19d   :  { %v914_v12 = vadd.f32 %v898_v42, %v802_v8  ;;  %v1733_v59 = vsel %vm1254_vm4, 1.0, %v3584_v50  ;;  %v1749_v8 = vsel %vm1302_vm15, 1.0, %v3584_v50  ;;  %v429_v27 = vmul.f32 %v1939_v37, %v2360_v62 }
 0x19e   :  { %v1365_v42 = vsel %vm3592_vm8, 0.0, %v1349_v23  ;;  %v430_v22 = vmul.f32 %v1940_v5, %v2511_v36  ;;  %v1350_v63 = vadd.f32 %v1749_v8, %v1733_v59  ;;  %vm1255_vm2 = vcmp.lt.f32.partialorder %v3006_v2, %v2753_v17 }
 0x19f   :  { %v930_v41 = vsub.f32 0.0, %v914_v12  ;;  %vm1303_vm1 = vcmp.le.f32.partialorder %v3006_v2, %v2753_v17  ;;  %vm1256_vm6 = vcmp.lt.f32.partialorder %v1232_v21, %v2753_v17  ;;  %vm1304_vm5 = vcmp.le.f32.partialorder %v1232_v21, %v2753_v17 }
 0x1a0   :  { %v3054_v25 = vpop.xlane.xlu0 %707  ;;  %1388 = vadd.xlane.f32.xlu1 %v1363_v4  ;;  %465 = vadd.xlane.f32.xlu2 %v464_v54  ;;  %v473_v62 = vsel %vm190_vm0, %v429_v27, 0.0  ;;  %vm1257_vm12 = vcmp.lt.f32.partialorder %v1237_v57, %v2753_v17  ;;  %vm1305_vm11 = vcmp.le.f32.partialorder %v1237_v57, %v2753_v17  ;;  %v476_v36 = vsel %vm190_vm0, %v430_v22, 0.0 }
 0x1a1   :  { %v947_v47 = vmul.f32 %v930_v41, %v3048_v55  ;;  %468 = vadd.xlane.f32.xlu0 %v467_v3  ;;  %v747_v15 = vmul.f32 1.442695, %v3054_v25  ;;  %vm3593_vm3 = vcmp.le.f32.partialorder %v2587_v0, %v2607_v11  ;;  %v1734_v2 = vsel %vm1255_vm2, 1.0, %v3584_v50 }
 0x1a2   :  { %v1366_v54 = vsel %vm3593_vm3, 0.0, %v1350_v63  ;;  %v1750_v41 = vsel %vm1303_vm1, 1.0, %v3584_v50  ;;  %v1735_v3 = vsel %vm1256_vm6, 1.0, %v3584_v50  ;;  %v1751_v7 = vsel %vm1304_vm5, 1.0, %v3584_v50 }
 0x1a3   :  { %v967_v32 = vsel %vm576_vm14, %v947_v47, 0.0  ;;  %1850 = vpow2.f32 %v747_v15  ;;  %v1736_v17 = vsel %vm1257_vm12, 1.0, %v3584_v50  ;;  %v1752_v4 = vsel %vm1305_vm11, 1.0, %v3584_v50 }
 0x1a4   :  { %v968_v31 = vadd.f32 %v967_v32, %v966_v14  ;;  %v1352_v28 = vadd.f32 %v1751_v7, %v1735_v3  ;;  %v1351_v56 = vadd.f32 %v1750_v41, %v1734_v2  ;;  %v1353_v9 = vadd.f32 %v1752_v4, %v1736_v17 }
 0x1a5   :  { %vm3594_vm0 = vcmp.le.f32.partialorder %v2587_v0, %v2557_v35  ;;  %vm3595_vm7 = vcmp.le.f32.partialorder %v2587_v0, %v2571_v19  ;;  %vm3596_vm10 = vcmp.le.f32.partialorder %v2587_v0, %v2593_v24  ;;  %vm1559_vm9 = vcmask 1040384  }
 0x1a6   :  { %v3079_v16 = vadd.f32 %v969_v43, %v968_v31  ;;  %v1368_v6 = vsel %vm3594_vm0, 0.0, %v1352_v28  ;;  %v1367_v61 = vsel %vm3595_vm7, 0.0, %v1351_v56  ;;  %v1369_v14 = vsel %vm3596_vm10, 0.0, %v1353_v9  ;;  %v3141_v43 = vld [vmem:[%s3543_s3 + $0x38] sm:$0xff] }
 0x1a7   :  { %vm1405_vm8 = vcmp.gt.f32.partialorder %v2913_v51, 0.5  ;;  %vm1406_vm2 = vcmp.gt.f32.partialorder %v2932_v45, 0.5  ;;  %vm1407_vm1 = vcmp.gt.f32.partialorder %v2991_v13, 0.5  ;;  %vm1408_vm6 = vcmp.gt.f32.partialorder %v2943_v58, 0.5 }
 0x1a8   :  { %v3081_v49 = vpop.xlane.xlu0 %716  ;;  %471 = vadd.xlane.f32.xlu1 %v470_v29  ;;  %1390 = vadd.xlane.f32.xlu2 %v1364_v53  ;;  %vm1409_vm5 = vcmp.gt.f32.partialorder %v3141_v43, 0.5  ;;  %v1758_v58 = vsel %vm1407_vm1, 1.0, %v3584_v50 }
 0x1a9   :  { %1392 = vadd.xlane.f32.xlu0 %v1365_v42  ;;  %v1851_v11 = vpop.eup %1850  ;;  %v753_v47 = vmul.f32 1.442695, %v3081_v49 }
 0x1aa   :  { %v836_v26 = vsub.f32 1.0, %v1851_v11 }
 0x1ab   :  { %1852 = vpow2.f32 %v753_v47 }
 0x1ac   :  { %1854 = vlog2.f32 %v836_v26 }
 0x1ad   :  { %1856 = vlog2.f32 %v2422_v38 }
 0x1b0   :  { %v3110_v12 = vpop.xlane.xlu0 %719  ;;  %1394 = vadd.xlane.f32.xlu1 %v1366_v54  ;;  %474 = vadd.xlane.f32.xlu2 %v473_v62 }
 0x1b1   :  { %477 = vadd.xlane.f32.xlu0 %v476_v36  ;;  %v755_v32 = vmul.f32 1.442695, %v3110_v12  ;;  %v1853_v35 = vpop.eup %1852  ;;  %v788_v36 = vmax.f32 %v3054_v25, -100.0 }
 0x1b2   :  { %v1855_v31 = vpop.eup %1854  ;;  %v839_v23 = vsub.f32 1.0, %v1853_v35 }
 0x1b3   :  { %1858 = vpow2.f32 %v755_v32  ;;  %v1857_v0 = vpop.eup %1856  ;;  %v860_v38 = vmul.f32 0.6931472, %v1855_v31  ;;  %v3178_v31 = vld [vmem:[%s3543_s3 + $0x60] sm:$0xff] }
 0x1b4   :  { %1860 = vlog2.f32 %v2424_v40  ;;  %v498_v29 = vmul.f32 0.6931472, %v1857_v0 }
 0x1b5   :  { %1862 = vlog2.f32 %v2437_v48  ;;  %v772_v48 = vsub.f32 1.0, %v3141_v43 }
 0x1b6   :  { %v528_v57 = vmax.f32 %v498_v29, -100.0 }
 0x1b7   :  { %v820_v21 = vsub.f32 1.0, %v772_v48  ;;  %v804_v11 = vmul.f32 %v788_v36, %v772_v48  ;;  %v3205_v36 = vld [vmem:[%s3543_s3 + $0x48] sm:$0xff] }
 0x1b8   :  { %v3122_v30 = vpop.xlane.xlu0 %722  ;;  %1398 = vadd.xlane.f32.xlu1 %v1368_v6  ;;  %1396 = vadd.xlane.f32.xlu2 %v1367_v61  ;;  %v3170_v6 = vld [vmem:[%s3543_s3 + $0x58] sm:$0xff]  ;;  %vm1411_vm0 = vcmp.gt.f32.partialorder %v3205_v36, 0.5 }
 0x1b9   :  { %1400 = vadd.xlane.f32.xlu0 %v1369_v14  ;;  %v757_v19 = vmul.f32 1.442695, %v3122_v30  ;;  %v1859_v24 = vpop.eup %1858  ;;  %v3597_v14 = vld [vmem:[#allocation15_spill] sm:$0xff]  ;;  %v776_v29 = vsub.f32 1.0, %v3170_v6 }
 0x1ba   :  { %v1861_v40 = vpop.eup %1860  ;;  %v840_v59 = vsub.f32 1.0, %v1859_v24 }
 0x1bb   :  { %1864 = vpow2.f32 %v757_v19  ;;  %v1863_v37 = vpop.eup %1862  ;;  %v496_v15 = vmul.f32 0.6931472, %v1861_v40 }
 0x1bc   :  { %1866 = vlog2.f32 %v2439_v44  ;;  %v884_v44 = vmax.f32 %v860_v38, -100.0  ;;  %v3155_v62 = vmul.f32 0.6931472, %v1863_v37 }
 0x1bd   :  { %1868 = vlog2.f32 %v839_v23  ;;  %v527_v4 = vmax.f32 %v496_v15, -100.0 }
 0x1be   :  { %1870 = vlog2.f32 %v2441_v33  ;;  %v900_v3 = vmul.f32 %v884_v44, %v820_v21  ;;  %v824_v44 = vsub.f32 1.0, %v776_v29 }
 0x1c0   :  { %v436_v18 = vpop.xlane.xlu0 %435  ;;  %v916_v19 = vadd.f32 %v900_v3, %v804_v11  ;;  %v3598_v11 = vld [vmem:[#allocation27_spill] sm:$0xff] }
 0x1c1   :  { %v480_v5 = vsub.f32 %v436_v18, %v2500_v60  ;;  %v1865_v22 = vpop.eup %1864  ;;  %v3162_v60 = vld [vmem:[%s3543_s3 + $0x50] sm:$0xff] }
 0x1c2   :  { %v1867_v33 = vpop.eup %1866  ;;  %v841_v7 = vsub.f32 1.0, %v1865_v22  ;;  %v775_v32 = vsub.f32 1.0, %v3162_v60  ;;  %v3194_v22 = vld [vmem:[%s3543_s3 + $0x40] sm:$0xff]  ;;  %v932_v15 = vsub.f32 0.0, %v916_v19  ;;  %v792_v19 = vmax.f32 %v3110_v12, -100.0 }
 0x1c3   :  { %v1869_v2 = vpop.eup %1868  ;;  %v544_v17 = vsub.f32 %v480_v5, %v528_v57  ;;  %v3164_v28 = vmul.f32 0.6931472, %v1867_v33  ;;  %v777_v5 = vsub.f32 1.0, %v3178_v31  ;;  %v3200_v33 = vld [vmem:[%s3543_s3 + $0x70] sm:$0xff]  ;;  %vm1410_vm12 = vcmp.gt.f32.partialorder %v3194_v22, 0.5 }
 0x1c4   :  { %v1871_v41 = vpop.eup %1870  ;;  %v866_v47 = vmul.f32 0.6931472, %v1869_v2  ;;  %v823_v38 = vsub.f32 1.0, %v775_v32 }
 0x1c5   :  { %v500_v26 = vmul.f32 0.6931472, %v1871_v41  ;;  %v561_v23 = vmul.f32 %v544_v17, %v2874_v1 }
 0x1c7   :  { %v3144_v53 = vpop.xlane.xlu1 %710  ;;  %v529_v21 = vmax.f32 %v500_v26, -100.0 }
 0x1c8   :  { %v3148_v8 = vpop.xlane.xlu0 %728  ;;  %v749_v42 = vmul.f32 1.442695, %v3144_v53 }
 0x1c9   :  { %v761_v27 = vmul.f32 1.442695, %v3148_v8 }
 0x1ca   :  { %1872 = vpow2.f32 %v749_v42  ;;  %v887_v42 = vmax.f32 %v866_v47, -100.0 }
 0x1cb   :  { %v3153_v63 = vpop.xlane.xlu2 %713  ;;  %1874 = vlog2.f32 %v840_v59  ;;  %v791_v59 = vmax.f32 %v3081_v49, -100.0  ;;  %v578_v49 = vsel %vm576_vm14, %v561_v23, 0.0 }
 0x1cc   :  { %v751_v54 = vmul.f32 1.442695, %v3153_v63  ;;  %1876 = vpow2.f32 %v761_v27 }
 0x1ce   :  { %1878 = vpow2.f32 %v751_v54 }
 0x1cf   :  { %v433_v56 = vpop.xlane.xlu1 %432  ;;  %1880 = vlog2.f32 %v3597_v14  ;;  %v825_v14 = vsub.f32 1.0, %v777_v5 }
 0x1d0   :  { %v1873_v25 = vpop.eup %1872  ;;  %v479_v61 = vsub.f32 %v433_v56, %v2488_v46  ;;  %1882 = vlog2.f32 %v841_v7  ;;  %v530_v46 = vmax.f32 %v3164_v28, -100.0  ;;  %v807_v28 = vmul.f32 %v791_v59, %v775_v32 }
 0x1d1   :  { %v837_v35 = vsub.f32 1.0, %v1873_v25  ;;  %v1875_v18 = vpop.eup %1874  ;;  %v903_v56 = vmul.f32 %v887_v42, %v823_v38  ;;  %v773_v25 = vsub.f32 1.0, %v3194_v22  ;;  %v774_v32 = vsub.f32 1.0, %v3205_v36 }
 0x1d2   :  { %v543_v0 = vsub.f32 %v479_v61, %v527_v4  ;;  %v1877_v24 = vpop.eup %1876  ;;  %v868_v41 = vmul.f32 0.6931472, %v1875_v18  ;;  %v3215_v61 = vld [vmem:[%s3545_s5 + $0x38] sm:$0xff]  ;;  %v789_v18 = vmax.f32 %v3144_v53, -100.0 }
 0x1d3   :  { %1884 = vlog2.f32 %v837_v35  ;;  %v3183_v40 = vpop.xlane.xlu2 %725  ;;  %v843_v3 = vsub.f32 1.0, %v1877_v24  ;;  %v821_v23 = vsub.f32 1.0, %v773_v25  ;;  %v3223_v24 = vpop.xlane.xlu0 %1370  ;;  %v822_v9 = vsub.f32 1.0, %v774_v32 }
 0x1d4   :  { %v1879_v48 = vpop.eup %1878  ;;  %v560_v37 = vmul.f32 %v543_v0, %v2890_v20  ;;  %v759_v27 = vmul.f32 1.442695, %v3183_v40  ;;  %v805_v12 = vmul.f32 %v789_v18, %v773_v25 }
 0x1d5   :  { %v838_v57 = vsub.f32 1.0, %v1879_v48  ;;  %v3208_v2 = vpop.eup %1880  ;;  %v888_v48 = vmax.f32 %v868_v41, -100.0 }
 0x1d6   :  { %v577_v54 = vsel %vm576_vm14, %v560_v37, 0.0  ;;  %1886 = vpow2.f32 %v759_v27  ;;  %v1883_v4 = vpop.eup %1882  ;;  %v949_v37 = vmul.f32 %v932_v15, %v3215_v61 }
 0x1d7   :  { %1888 = vlog2.f32 %v838_v57  ;;  %v579_v7 = vadd.f32 %v578_v49, %v577_v54  ;;  %v439_v17 = vpop.xlane.xlu1 %438  ;;  %v870_v59 = vmul.f32 0.6931472, %v1883_v4  ;;  %v919_v57 = vadd.f32 %v903_v56, %v807_v28  ;;  %v3599_v54 = vld [vmem:[#allocation25_spill] sm:$0xff] }
 0x1d8   :  { %v481_v47 = vsub.f32 %v439_v17, %v3598_v11  ;;  %1890 = vlog2.f32 %v843_v3  ;;  %v3232_v3 = vld [vmem:[%s3543_s3 + $0x68] sm:$0xff]  ;;  %v904_v28 = vmul.f32 %v888_v48, %v824_v44 }
 0x1d9   :  { %v1885_v26 = vpop.eup %1884  ;;  %v889_v56 = vmax.f32 %v870_v59, -100.0 }
 0x1da   :  { %v862_v0 = vmul.f32 0.6931472, %v1885_v26  ;;  %v545_v38 = vsub.f32 %v481_v47, %v529_v21  ;;  %v790_v26 = vmax.f32 %v3153_v63, -100.0 }
 0x1db   :  { %v442_v42 = vpop.xlane.xlu2 %441 }
 0x1dc   :  { %v1887_v27 = vpop.eup %1886  ;;  %v885_v49 = vmax.f32 %v862_v0, -100.0  ;;  %v562_v53 = vmul.f32 %v545_v38, %v2925_v10  ;;  %v482_v17 = vsub.f32 %v442_v42, %v3599_v54  ;;  %v808_v42 = vmul.f32 %v792_v19, %v776_v29 }
 0x1dd   :  { %v1889_v11 = vpop.eup %1888  ;;  %v842_v35 = vsub.f32 1.0, %v1887_v27  ;;  %v793_v27 = vmax.f32 %v3122_v30, -100.0  ;;  %v806_v44 = vmul.f32 %v790_v26, %v774_v32  ;;  %v905_v54 = vmul.f32 %v889_v56, %v825_v14  ;;  %v3252_v30 = vld [vmem:[%s3545_s5 + $0x50] sm:$0xff]  ;;  %v3600_v26 = vld [vmem:[#allocation16_spill] sm:$0xff] }
 0x1de   :  { %v901_v21 = vmul.f32 %v885_v49, %v821_v23  ;;  %v864_v41 = vmul.f32 0.6931472, %v1889_v11  ;;  %v580_v15 = vsel %vm576_vm14, %v562_v53, 0.0  ;;  %v546_v4 = vsub.f32 %v482_v17, %v530_v46  ;;  %v1891_v38 = vpop.eup %1890  ;;  %v3245_v46 = vld [vmem:[%s3545_s5 + $0x40] sm:$0xff]  ;;  %v3255_v11 = vpop.xlane.xlu0 %1374 }
 0x1df   :  { %1892 = vlog2.f32 %v842_v35  ;;  %v581_v47 = vadd.f32 %v580_v15, %v579_v7  ;;  %v3235_v0 = vpop.xlane.xlu1 %731  ;;  %v778_v7 = vsub.f32 1.0, %v3232_v3  ;;  %v935_v49 = vsub.f32 0.0, %v919_v57 }
 0x1e0   :  { %v917_v25 = vadd.f32 %v901_v21, %v805_v12  ;;  %v886_v18 = vmax.f32 %v864_v41, -100.0  ;;  %v563_v63 = vmul.f32 %v546_v4, %v2983_v34  ;;  %v763_v23 = vmul.f32 1.442695, %v3235_v0  ;;  %v3266_v41 = vld [vmem:[%s3545_s5 + $0x48] sm:$0xff]  ;;  %v3268_v4 = vpop.f32.mrf.mxu0 }
 0x1e1   :  { %v920_v53 = vadd.f32 %v904_v28, %v808_v42  ;;  %v874_v29 = vmul.f32 0.6931472, %v1891_v38  ;;  %v809_v14 = vmul.f32 %v793_v27, %v777_v5  ;;  %v3601_v57 = vsub.f32 1.0, %v3200_v33  ;;  %v3277_v42 = vld [vmem:[%s3545_s5 + $0x58] sm:$0xff] }
 0x1e2   :  { %v933_v35 = vsub.f32 0.0, %v917_v25  ;;  %v902_v48 = vmul.f32 %v886_v18, %v822_v9  ;;  %v582_v59 = vsel %vm576_vm14, %v563_v63, 0.0  ;;  %1894 = vpow2.f32 %v763_v23 }
 0x1e3   :  { %v583_v17 = vadd.f32 %v582_v59, %v581_v47  ;;  %v971_v9 = vsel %vm576_vm14, %v949_v37, 0.0  ;;  %1896 = vlog2.f32 %v3600_v26  ;;  %v827_v21 = vsub.f32 1.0, %v3601_v57 }
 0x1e4   :  { %v950_v19 = vmul.f32 %v933_v35, %v3245_v46  ;;  %v918_v32 = vadd.f32 %v902_v48, %v806_v44  ;;  %v826_v15 = vsub.f32 1.0, %v778_v7  ;;  %v794_v56 = vmax.f32 %v3183_v40, -100.0  ;;  %v3602_v48 = vld [vmem:[#allocation28_spill] sm:$0xff] }
 0x1e5   :  { %v1893_v12 = vpop.eup %1892  ;;  %v952_v25 = vmul.f32 %v935_v49, %v3252_v30  ;;  %v936_v5 = vsub.f32 0.0, %v920_v53  ;;  %v921_v18 = vadd.f32 %v905_v54, %v809_v14  ;;  %v972_v23 = vadd.f32 %v971_v9, %v3079_v16 }
 0x1e6   :  { %v973_v28 = vsel %vm576_vm14, %v950_v19, 0.0  ;;  %v934_v37 = vsub.f32 0.0, %v918_v32  ;;  %v872_v47 = vmul.f32 0.6931472, %v1893_v12  ;;  %v891_v27 = vmax.f32 %v874_v29, -100.0 }
 0x1e7   :  { %v445_v63 = vpop.xlane.xlu1 %444  ;;  %v795_v59 = vmax.f32 %v3148_v8, -100.0  ;;  %v974_v53 = vadd.f32 %v973_v28, %v972_v23  ;;  %v810_v19 = vmul.f32 %v794_v56, %v778_v7  ;;  %v3603_v32 = vmax.f32 %v3155_v62, -100.0  ;;  %v3293_v7 = vld [vmem:[%s3545_s5 + $0x60] sm:$0xff]  ;;  %v3298_v62 = vld [vmem:[%s3543_s3 + $0x78] sm:$0xff] }
 0x1e8   :  { %v1895_v38 = vpop.eup %1894  ;;  %v951_v44 = vmul.f32 %v934_v37, %v3266_v41  ;;  %v890_v35 = vmax.f32 %v872_v47, -100.0  ;;  %v483_v40 = vsub.f32 %v445_v63, %v3602_v48  ;;  %v977_v26 = vsel %vm576_vm14, %v952_v25, 0.0  ;;  %v1152_v56 = vpop.f32.mrf.mxu0  ;;  %v3604_v25 = vld [vmem:[#allocation14_spill] sm:$0xff] }
 0x1e9   :  { %v844_v49 = vsub.f32 1.0, %v1895_v38  ;;  %v1897_v12 = vpop.eup %1896  ;;  %v953_v29 = vmul.f32 %v936_v5, %v3277_v42  ;;  %v937_v57 = vsub.f32 0.0, %v921_v18  ;;  %v907_v37 = vmul.f32 %v891_v27, %v827_v21  ;;  %v451_v63 = vpop.xlane.xlu0 %450  ;;  %v3308_v27 = vld [vmem:[%s3545_s5 + $0x68] sm:$0xff] }
 0x1ea   :  { %v975_v54 = vsel %vm576_vm14, %v951_v44, 0.0  ;;  %v906_v16 = vmul.f32 %v890_v35, %v826_v15  ;;  %v547_v9 = vsub.f32 %v483_v40, %v3603_v32  ;;  %v3605_v21 = vsub.f32 1.0, %v3200_v33 }
 0x1eb   :  { %1898 = vlog2.f32 %v844_v49  ;;  %v976_v14 = vadd.f32 %v975_v54, %v974_v53  ;;  %v3288_v28 = vpop.xlane.xlu2 %1372  ;;  %v508_v38 = vmul.f32 0.6931472, %v3208_v2  ;;  %v979_v35 = vsel %vm576_vm14, %v953_v29, 0.0  ;;  %v3606_v54 = vld [vmem:[#allocation26_spill] sm:$0xff] }
 0x1ec   :  { %v922_v47 = vadd.f32 %v906_v16, %v810_v19  ;;  %v564_v8 = vmul.f32 %v547_v9, %v3017_v39  ;;  %1900 = vlog2.f32 %v3604_v25  ;;  %v811_v5 = vmul.f32 %v795_v59, %v3605_v21  ;;  %v3607_v25 = vld [vmem:[#allocation30_spill] sm:$0xff] }
 0x1ed   :  { %v978_v15 = vadd.f32 %v977_v26, %v976_v14  ;;  %v954_v48 = vmul.f32 %v937_v57, %v3293_v7  ;;  %v780_v49 = vsub.f32 1.0, %v3298_v62  ;;  %v506_v53 = vmul.f32 0.6931472, %v1897_v12 }
 0x1ee   :  { %v938_v18 = vsub.f32 0.0, %v922_v47  ;;  %v584_v23 = vsel %vm576_vm14, %v564_v8, 0.0  ;;  %v923_v40 = vadd.f32 %v907_v37, %v811_v5  ;;  %v485_v19 = vsub.f32 %v451_v63, %v3606_v54  ;;  %v3608_v5 = vld [vmem:[#allocation17_spill] sm:$0xff] }
 0x1ef   :  { %v585_v44 = vadd.f32 %v584_v23, %v583_v17  ;;  %v980_v16 = vadd.f32 %v979_v35, %v978_v15  ;;  %v828_v32 = vsub.f32 1.0, %v780_v49  ;;  %v796_v9 = vmax.f32 %v3235_v0, -100.0  ;;  %v3323_v15 = vld [vmem:[%s3545_s5 + $0x70] sm:$0xff] }
 0x1f0   :  { %v955_v2 = vmul.f32 %v938_v18, %v3308_v27  ;;  %v533_v14 = vmax.f32 %v508_v38, -100.0  ;;  %v939_v47 = vsub.f32 0.0, %v923_v40  ;;  %v981_v37 = vsel %vm576_vm14, %v954_v48, 0.0  ;;  %v3609_v35 = vld [vmem:[#allocation19_spill] sm:$0xff]  ;;  %v3610_v40 = vld [vmem:[#allocation18_spill] sm:$0xff] }
 0x1f1   :  { %v1899_v59 = vpop.eup %1898  ;;  %v532_v56 = vmax.f32 %v506_v53, -100.0  ;;  %v982_v0 = vadd.f32 %v981_v37, %v980_v16  ;;  %1902 = vlog2.f32 %v3608_v5  ;;  %v812_v18 = vmul.f32 %v796_v9, %v780_v49  ;;  %v3335_v49 = vld [vmem:[%s3545_s5 + $0x78] sm:$0xff] }
 0x1f2   :  { %v876_v26 = vmul.f32 0.6931472, %v1899_v59  ;;  %v1901_v17 = vpop.eup %1900  ;;  %v549_v12 = vsub.f32 %v485_v19, %v533_v14  ;;  %v983_v23 = vsel %vm576_vm14, %v955_v2, 0.0  ;;  %1904 = vlog2.f32 %v3609_v35  ;;  %v3612_v14 = vld [vmem:[#allocation21_spill] sm:$0xff]  ;;  %v3613_v5 = vld [vmem:[#allocation31_spill] sm:$0xff] }
 0x1f3   :  { %v3316_v8 = vpop.xlane.xlu1 %1376  ;;  %v448_v57 = vpop.xlane.xlu2 %447  ;;  %v510_v38 = vmul.f32 0.6931472, %v1901_v17  ;;  %1906 = vlog2.f32 %v3610_v40  ;;  %v956_v53 = vmul.f32 %v939_v47, %v3323_v15  ;;  %v984_v16 = vadd.f32 %v983_v23, %v982_v0 }
 0x1f4   :  { %v892_v29 = vmax.f32 %v876_v26, -100.0  ;;  %v484_v21 = vsub.f32 %v448_v57, %v3607_v25  ;;  %v566_v54 = vmul.f32 %v549_v12, %v3043_v52  ;;  %v3338_v2 = vrot.slane %v3268_v4, 2 }
 0x1f5   :  { %v534_v26 = vmax.f32 %v510_v38, -100.0  ;;  %v985_v25 = vsel %vm576_vm14, %v956_v53, 0.0  ;;  %vm1417_vm1 = vcmp.gt.f32.partialorder %v3298_v62, 0.5 }
 0x1f6   :  { %v908_v63 = vmul.f32 %v892_v29, %v828_v32  ;;  %v548_v48 = vsub.f32 %v484_v21, %v532_v56  ;;  %v3611_v32 = vld [vmem:[#allocation22_spill] sm:$0xff]  ;;  %v1941_v29 = vld [vmem:[%s3543_s3] sm:$0xff]  ;;  %v588_v0 = vsel %vm576_vm14, %v566_v54, 0.0  ;;  %v986_v23 = vadd.f32 %v985_v25, %v984_v16 }
 0x1f7   :  { %1908 = vlog2.f32 %v3611_v32  ;;  %v1903_v47 = vpop.eup %1902  ;;  %vm1402_vm13 = vcmp.gt.f32.partialorder %v1941_v29, 0.5  ;;  %vm1544_vm11 = vweird.f32 %v3338_v2 }
 0x1f8   :  { %v924_v59 = vadd.f32 %v908_v63, %v812_v18  ;;  %v565_v19 = vmul.f32 %v548_v48, %v3048_v55  ;;  %1910 = vlog2.f32 %v3612_v14  ;;  %v1905_v21 = vpop.eup %1904 }
 0x1f9   :  { %1912 = vrcp.f32 %v3338_v2  ;;  %v1907_v38 = vpop.eup %1906  ;;  %v514_v54 = vmul.f32 0.6931472, %v1905_v21 }
 0x1fa   :  { %v940_v9 = vsub.f32 0.0, %v924_v59  ;;  %v586_v17 = vsel %vm576_vm14, %v565_v19, 0.0  ;;  %v1753_v19 = vsel %vm1402_vm13, 1.0, %v3584_v50  ;;  %v512_v16 = vmul.f32 0.6931472, %v1907_v38 }
 0x1fb   :  { %v587_v57 = vadd.f32 %v586_v17, %v585_v44  ;;  %v454_v37 = vpop.xlane.xlu1 %453  ;;  %v3346_v56 = vpop.xlane.xlu2 %1378  ;;  %v1942_v44 = vld [vmem:[%s3543_s3 + $0x8] sm:$0xff]  ;;  %v1450_v29 = vmul.f32 %v1753_v19, %v2890_v20  ;;  %vm1412_vm13 = vcmp.gt.f32.partialorder %v3162_v60, 0.5 }
 0x1fc   :  { %v957_v12 = vmul.f32 %v940_v9, %v3335_v49  ;;  %v486_v18 = vsub.f32 %v454_v37, %v3613_v5  ;;  %v3352_v63 = vpop.xlane.xlu0 %1380  ;;  %vm1403_vm4 = vcmp.gt.f32.partialorder %v1942_v44, 0.5  ;;  %v1943_v9 = vld [vmem:[%s3543_s3 + $0x10] sm:$0xff]  ;;  %v516_v37 = vmul.f32 0.6931472, %v1903_v47  ;;  %v3615_v19 = vld [vmem:[#allocation29_spill] sm:$0xff] }
 0x1fd   :  { %v589_v35 = vadd.f32 %v588_v0, %v587_v57  ;;  %v1909_v53 = vpop.eup %1908  ;;  %vm1404_vm15 = vcmp.gt.f32.partialorder %v1943_v9, 0.5  ;;  %v1754_v14 = vsel %vm1403_vm4, 1.0, %v3584_v50  ;;  %v535_v38 = vmax.f32 %v512_v16, -100.0 }
 0x1fe   :  { %v987_v48 = vsel %vm576_vm14, %v957_v12, 0.0  ;;  %v550_v40 = vsub.f32 %v486_v18, %v534_v26  ;;  %v1911_v32 = vpop.eup %1910  ;;  %v1574_v26 = vrot.slane %v3268_v4, 3  ;;  %v1755_v25 = vsel %vm1404_vm15, 1.0, %v3584_v50 }
 0x1ff   :  { %v988_v59 = vadd.f32 %v987_v48, %v986_v23  ;;  %v3367_v57 = vpop.eup %1912  ;;  %v1451_v21 = vmul.f32 %v1754_v14, %v2874_v1  ;;  %v536_v23 = vmax.f32 %v514_v54, -100.0  ;;  %v3376_v44 = vmul.f32 0.6931472, %v1909_v53  ;;  %v3614_v48 = vld [vmem:[#allocation33_spill] sm:$0xff]  ;;  %v3616_v54 = vld [vmem:[#allocation20_spill] sm:$0xff] }
 0x200   :  { %v567_v17 = vmul.f32 %v550_v40, %v3215_v61  ;;  %v3379_v40 = vmul.f32 0.6931472, %v1911_v32  ;;  %v1576_v51 = vsel %vm1559_vm9, %v1574_v26, 0.0  ;;  %v1756_v9 = vsel %vm1405_vm8, 1.0, %v3584_v50 }
 0x201   :  { %989 = vadd.xlane.f32.xlu1 %v988_v59  ;;  %v1540_v59 = vmul.f32 %v3367_v57, %v3338_v2  ;;  %1914 = vlog2.f32 %v3616_v54  ;;  %v1467_v16 = vmul.f32 %v1450_v29, %v3223_v24  ;;  %v1468_v32 = vmul.f32 %v1451_v21, %v3288_v28 }
 0x202   :  { %v590_v12 = vsel %vm576_vm14, %v567_v17, 0.0  ;;  %v537_v17 = vmax.f32 %v516_v37, -100.0  ;;  %v1757_v26 = vsel %vm1406_vm2, 1.0, %v3584_v50  ;;  %v538_v24 = vmax.f32 %v3379_v40, -100.0  ;;  %v3618_v40 = vld [vmem:[#allocation34_spill] sm:$0xff] }
 0x203   :  { %v591_v0 = vadd.f32 %v590_v12, %v589_v35  ;;  %v3374_v5 = vpop.xlane.xlu1 %1382  ;;  %v457_v18 = vpop.xlane.xlu2 %456  ;;  %v1452_v35 = vmul.f32 %v1755_v25, %v2925_v10  ;;  %v3617_v12 = vld [vmem:[#allocation24_spill] sm:$0xff]  ;;  %v1453_v10 = vmul.f32 %v1756_v9, %v2983_v34  ;;  %v1541_v25 = vsub.f32 1.0, %v1540_v59 }
 0x204   :  { %v460_v47 = vpop.xlane.xlu0 %459  ;;  %v487_v20 = vsub.f32 %v457_v18, %v3614_v48  ;;  %1916 = vlog2.f32 %v3617_v12  ;;  %v1484_v29 = vsel %vm576_vm14, %v1467_v16, 0.0  ;;  %v1485_v21 = vsel %vm576_vm14, %v1468_v32, 0.0 }
 0x205   :  { %v488_v1 = vsub.f32 %v460_v47, %v3615_v19  ;;  %v1469_v28 = vmul.f32 %v1452_v35, %v3255_v11  ;;  %v1454_v48 = vmul.f32 %v1757_v26, %v3017_v39  ;;  %v1486_v9 = vadd.f32 %v1485_v21, %v1484_v29 }
 0x206   :  { %v551_v53 = vsub.f32 %v487_v20, %v535_v38  ;;  %v539_v38 = vmax.f32 %v3376_v44, -100.0  ;;  %v1759_v54 = vsel %vm1408_vm6, 1.0, %v3584_v50  ;;  %vm1545_vm3 = vweird.f32 %v3367_v57 }
 0x207   :  { %v552_v14 = vsub.f32 %v488_v1, %v536_v23  ;;  %v1915_v19 = vpop.eup %1914  ;;  %v1470_v1 = vmul.f32 %v1453_v10, %v3316_v8  ;;  %v1487_v39 = vsel %vm576_vm14, %v1469_v28, 0.0  ;;  %v1471_v43 = vmul.f32 %v1454_v48, %v3346_v56  ;;  %vm3433_vm7 = vmor %vm1544_vm11, %vm1545_vm3 }
 0x208   :  { %v568_v18 = vmul.f32 %v551_v53, %v3245_v46  ;;  %v1760_v16 = vsel %vm1409_vm5, 1.0, %v3584_v50  ;;  %v1488_v12 = vadd.f32 %v1487_v39, %v1486_v9  ;;  %v1456_v10 = vmul.f32 %v1759_v54, %v3043_v52  ;;  %v3625_v39 = vld [vmem:[#allocation23_spill] sm:$0xff] }
 0x209   :  { %1577 = vadd.xlane.f32.xlu1 %v1576_v51  ;;  %v569_v45 = vmul.f32 %v552_v14, %v3266_v41  ;;  %v1489_v13 = vsel %vm576_vm14, %v1470_v1, 0.0  ;;  %v1548_v14 = vand.u32 2147483647, %v3338_v2  ;;  %v1761_v28 = vsel %vm1410_vm12, 1.0, %v3584_v50 }
 0x20a   :  { %v592_v37 = vsel %vm576_vm14, %v568_v18, 0.0  ;;  %v3412_v35 = vpop.eup %1916  ;;  %v1455_v18 = vmul.f32 %v1758_v58, %v3048_v55  ;;  %v1490_v55 = vadd.f32 %v1489_v13, %v1488_v12  ;;  %v1491_v52 = vsel %vm576_vm14, %v1471_v43, 0.0 }
 0x20b   :  { %v593_v34 = vadd.f32 %v592_v37, %v591_v0  ;;  %v463_v23 = vpop.xlane.xlu1 %462  ;;  %v1385_v47 = vpop.xlane.xlu2 %1384  ;;  %v594_v20 = vsel %vm576_vm14, %v569_v45, 0.0  ;;  %v1542_v0 = vmul.f32 %v3367_v57, %v1541_v25  ;;  %v1533_v25 = vrot.slane %v3268_v4, 1 }
 0x20c   :  { %v489_v59 = vsub.f32 %v463_v23, %v3618_v40  ;;  %v3407_v11 = vpop.xlane.xlu0 %1386  ;;  %v1762_v21 = vsel %vm1411_vm0, 1.0, %v3584_v50  ;;  %v3621_v23 = vld [vmem:[#allocation35_spill] sm:$0xff]  ;;  %vm3451_vm10 = vcmp.eq.f32.partialorder %v1548_v14, 8.507059e+37  ;;  %v1472_v1 = vmul.f32 %v1455_v18, %v3352_v63 }
 0x20d   :  { %v595_v51 = vadd.f32 %v594_v20, %v593_v34  ;;  %v1543_v32 = vadd.f32 %v3367_v57, %v1542_v0  ;;  %v3622_v20 = vld [vmem:[#allocation32_spill] sm:$0xff]  ;;  %v522_v0 = vmul.f32 0.6931472, %v1915_v19  ;;  %1918 = vlog2.f32 %v3625_v39 }
 0x20e   :  { %v553_v53 = vsub.f32 %v489_v59, %v537_v17  ;;  %v1550_v17 = vand.u32 2147483648, %v3338_v2  ;;  %v1457_v2 = vmul.f32 %v1760_v16, %v3215_v61  ;;  %v1492_v9 = vadd.f32 %v1491_v52, %v1490_v55 }
 0x20f   :  { %v1547_v22 = vsel %vm3433_vm7, %v3367_v57, %v1543_v32  ;;  %v1535_v57 = vadd.f32 %v1533_v25, %v3268_v4  ;;  %v1459_v63 = vmul.f32 %v1762_v21, %v3266_v41  ;;  %v1763_v60 = vsel %vm1412_vm13, 1.0, %v3584_v50  ;;  %v3626_v32 = vld [vmem:[#allocation36_spill] sm:$0xff] }
 0x210   :  { %v570_v8 = vmul.f32 %v553_v53, %v3252_v30  ;;  %v1551_v59 = vor.u32 1.1754944e-38, %v1550_v17  ;;  %v1458_v53 = vmul.f32 %v1761_v28, %v3245_v46  ;;  %v1474_v54 = vmul.f32 %v1457_v2, %v1385_v47 }
 0x211   :  { %v1493_v19 = vsel %vm576_vm14, %v1472_v1, 0.0  ;;  %vm1413_vm4 = vcmp.gt.f32.partialorder %v3170_v6, 0.5  ;;  %v540_v46 = vmax.f32 %v522_v0, -100.0  ;;  %vm1414_vm15 = vcmp.gt.f32.partialorder %v3178_v31, 0.5 }
 0x212   :  { %v596_v56 = vsel %vm576_vm14, %v570_v8, 0.0  ;;  %v1497_v16 = vsel %vm576_vm14, %v1474_v54, 0.0  ;;  %v1460_v12 = vmul.f32 %v1763_v60, %v3252_v30  ;;  %v1764_v6 = vsel %vm1413_vm4, 1.0, %v3584_v50 }
 0x213   :  { %v597_v45 = vadd.f32 %v596_v56, %v595_v51  ;;  %v1389_v37 = vpop.xlane.xlu1 %1388  ;;  %v466_v29 = vpop.xlane.xlu2 %465  ;;  %v1473_v51 = vmul.f32 %v1456_v10, %v3374_v5  ;;  %v1475_v25 = vmul.f32 %v1458_v53, %v3407_v11  ;;  %v1765_v31 = vsel %vm1414_vm15, 1.0, %v3584_v50 }
 0x214   :  { %v469_v34 = vpop.xlane.xlu0 %468  ;;  %v490_v48 = vsub.f32 %v466_v29, %v3621_v23  ;;  %v1919_v18 = vpop.eup %1918  ;;  %v526_v2 = vmul.f32 0.6931472, %v3412_v35  ;;  %v1461_v30 = vmul.f32 %v1764_v6, %v3277_v42  ;;  %vm1416_vm8 = vcmp.gt.f32.partialorder %v3200_v33, 0.5  ;;  %v134_v33 = vld [vmem:[%s3548_s8] sm:$0x1] }
 0x215   :  { %v491_v40 = vsub.f32 %v469_v34, %v3622_v20  ;;  %v1495_v44 = vsel %vm576_vm14, %v1473_v51, 0.0  ;;  %v524_v55 = vmul.f32 0.6931472, %v1919_v18  ;;  %v1462_v34 = vmul.f32 %v1765_v31, %v3293_v7 }
 0x216   :  { %v554_v36 = vsub.f32 %v490_v48, %v538_v24  ;;  %v1552_v24 = vsel %vm3451_vm10, %v1551_v59, %v1547_v22  ;;  %v1499_v11 = vsel %vm576_vm14, %v1475_v25, 0.0  ;;  %vm1415_vm2 = vcmp.gt.f32.partialorder %v3232_v3, 0.5  ;;  %v3627_v59 = vld [vmem:[#allocation37_spill] sm:$0xff] }
 0x217   :  { %v555_v58 = vsub.f32 %v491_v40, %v539_v38  ;;  %v1494_v38 = vadd.f32 %v1493_v19, %v1492_v9  ;;  %v1553_v26 = vmul.f32 %v1552_v24, %v1535_v57  ;;  %v542_v23 = vmax.f32 %v526_v2, -100.0 }
 0x218   :  { %v571_v43 = vmul.f32 %v554_v36, %v3277_v42  ;;  %v541_v61 = vmax.f32 %v524_v55, -100.0  ;;  %v3628_v36 = vld [vmem:[#allocation38_spill] sm:$0xff]  ;;  %v1767_v3 = vsel %vm1416_vm8, 1.0, %v3584_v50  ;;  %v1766_v39 = vsel %vm1415_vm2, 1.0, %v3584_v50 }
 0x219   :  { %v572_v5 = vmul.f32 %v555_v58, %v3293_v7  ;;  %v1496_v10 = vadd.f32 %v1495_v44, %v1494_v38  ;;  %1920 = vlog2.f32 %v1553_v26  ;;  %v1464_v62 = vmul.f32 %v1767_v3, %v3323_v15 }
 0x21a   :  { %v598_v4 = vsel %vm576_vm14, %v571_v43, 0.0  ;;  %v1463_v60 = vmul.f32 %v1766_v39, %v3308_v27  ;;  %vm1536_vm6 = vcmp.gt.f32.partialorder %v134_v33, 0.0  ;;  %vm57_vm5 = vcmask 0  }
 0x21b   :  { %v599_v47 = vadd.f32 %v598_v4, %v597_v45  ;;  %v472_v8 = vpop.xlane.xlu1 %471  ;;  %v1391_v41 = vpop.xlane.xlu2 %1390  ;;  %v600_v13 = vsel %vm576_vm14, %v572_v5, 0.0  ;;  %v1476_v45 = vmul.f32 %v1459_v63, %v1389_v37  ;;  %v1498_v29 = vadd.f32 %v1497_v16, %v1496_v10  ;;  %58 = vst.msk [vmem:[#allocation3] sm:$0x1] %vm57_vm5, %v3584_v50 }
 0x21c   :  { %v492_v14 = vsub.f32 %v472_v8, %v3626_v32  ;;  %v1393_v17 = vpop.xlane.xlu0 %1392  ;;  %v1477_v21 = vmul.f32 %v1460_v12, %v1391_v41  ;;  %v1768_v63 = vsel %vm1417_vm1, 1.0, %v3584_v50  ;;  %59 = vst.msk [vmem:[#allocation4] sm:$0x1] %vm57_vm5, %v3584_v50 }
 0x21d   :  { %v601_v56 = vadd.f32 %v600_v13, %v599_v47  ;;  %v1501_v37 = vsel %vm576_vm14, %v1476_v45, 0.0  ;;  %v1500_v48 = vadd.f32 %v1499_v11, %v1498_v29  ;;  %v1478_v9 = vmul.f32 %v1461_v30, %v1393_v17  ;;  %60 = vst.msk [vmem:[#allocation5] sm:$0x1] %vm57_vm5, %v3584_v50 }
 0x21e   :  { %v556_v28 = vsub.f32 %v492_v14, %v540_v46  ;;  %v1503_v42 = vsel %vm576_vm14, %v1477_v21, 0.0  ;;  %v1465_v4 = vmul.f32 %v1768_v63, %v3335_v49  ;;  %61 = vst.msk [vmem:[#allocation6] sm:$0x1] %vm57_vm5, %v3584_v50 }
 0x21f   :  { %v1502_v51 = vadd.f32 %v1501_v37, %v1500_v48  ;;  %v1921_v53 = vpop.eup %1920  ;;  %v1505_v19 = vsel %vm576_vm14, %v1478_v9, 0.0  ;;  %62 = vst.msk [vmem:[#allocation7] sm:$0x1] %vm57_vm5, %v3584_v50 }
 0x220   :  { %v573_v52 = vmul.f32 %v556_v28, %v3308_v27  ;;  %v1555_v41 = vmul.f32 0.6931472, %v1921_v53 }
 0x221   :  { %v1504_v54 = vadd.f32 %v1503_v42, %v1502_v51 }
 0x222   :  { %v602_v35 = vsel %vm576_vm14, %v573_v52, 0.0 }
 0x223   :  { %v1395_v20 = vpop.xlane.xlu1 %1394  ;;  %v475_v40 = vpop.xlane.xlu2 %474  ;;  %v603_v22 = vadd.f32 %v602_v35, %v601_v56  ;;  %v1506_v38 = vadd.f32 %v1505_v19, %v1504_v54 }
 0x224   :  { %v478_v7 = vpop.xlane.xlu0 %477  ;;  %v493_v1 = vsub.f32 %v475_v40, %v3627_v59  ;;  %v1479_v58 = vmul.f32 %v1462_v34, %v1395_v20 }
 0x225   :  { %v494_v0 = vsub.f32 %v478_v7, %v3628_v36 }
 0x226   :  { %v557_v57 = vsub.f32 %v493_v1, %v541_v61  ;;  %v1507_v44 = vsel %vm576_vm14, %v1479_v58, 0.0 }
 0x227   :  { %v558_v43 = vsub.f32 %v494_v0, %v542_v23  ;;  %v1508_v14 = vadd.f32 %v1507_v44, %v1506_v38  ;;  %v1557_v38 = vld [vmem:[#allocation7] sm:$0x1] }
 0x228   :  { %v574_v5 = vmul.f32 %v557_v57, %v3323_v15 }
 0x229   :  { %v575_v24 = vmul.f32 %v558_v43, %v3335_v49  ;;  %v1556_v49 = vsel %vm1536_vm6, %v1555_v41, 0.0 }
 0x22a   :  { %v604_v46 = vsel %vm576_vm14, %v574_v5, 0.0  ;;  %v1558_v25 = vmul.f32 %v1556_v49, %v134_v33 }
 0x22b   :  { %v1399_v47 = vpop.xlane.xlu1 %1398  ;;  %v1397_v8 = vpop.xlane.xlu2 %1396  ;;  %v605_v15 = vadd.f32 %v604_v46, %v603_v22  ;;  %v606_v32 = vsel %vm576_vm14, %v575_v24, 0.0 }
 0x22c   :  { %v1481_v27 = vmul.f32 %v1464_v62, %v1399_v47  ;;  %v1401_v16 = vpop.xlane.xlu0 %1400  ;;  %v1480_v13 = vmul.f32 %v1463_v60, %v1397_v8  ;;  %v1560_v28 = vsel %vm1559_vm9, %v1558_v25, 0.0  ;;  %v559_v62 = vld [vmem:[#allocation3] sm:$0x1]  ;;  %v941_v60 = vld [vmem:[#allocation4] sm:$0x1] }
 0x22d   :  { %v607_v17 = vadd.f32 %v606_v32, %v605_v15  ;;  %v1482_v12 = vmul.f32 %v1465_v4, %v1401_v16  ;;  %v1466_v4 = vld [vmem:[#allocation5] sm:$0x1]  ;;  %v1592_v47 = vld [vmem:[#allocation9] sm:$0x1]  ;;  %v1573_v15 = vld [vmem:[#allocation6] sm:$0x1] }
 0x22e   :  { %v1509_v18 = vsel %vm576_vm14, %v1480_v13, 0.0  ;;  %v1511_v6 = vsel %vm576_vm14, %v1481_v27, 0.0  ;;  %1922 = vrcp.f32 %v1592_v47 }
 0x22f   :  { %v1510_v10 = vadd.f32 %v1509_v18, %v1508_v14  ;;  %608 = vadd.xlane.f32.xlu2 %v607_v17  ;;  %v1513_v26 = vsel %vm576_vm14, %v1482_v12, 0.0  ;;  %v1973_v14 = vmov 128.0   ;;  %v1593_v17 = vld [vmem:[#allocation10] sm:$0x1]  ;;  %v1974_v12 = vmov 8.0  }
 0x230   :  { %1924 = vrcp.f32 %v1973_v14  ;;  %v1621_v49 = vmul.f32 8.0, %v1593_v17  ;;  %vm1602_vm14 = vweird.f32 %v1592_v47 }
 0x231   :  { %v1512_v56 = vadd.f32 %v1511_v6, %v1510_v10  ;;  %1926 = vrcp.f32 %v1974_v12 }
 0x233   :  { %v1514_v45 = vadd.f32 %v1513_v26, %v1512_v56 }
 0x234   :  { %v1923_v18 = vpop.eup %1922 }
 0x235   :  { %1515 = vadd.xlane.f32.xlu0 %v1514_v45  ;;  %v1598_v6 = vmul.f32 %v1923_v18, %v1592_v47  ;;  %vm1603_vm9 = vweird.f32 %v1923_v18 }
 0x236   :  { %v1925_v10 = vpop.eup %1924  ;;  %vm3530_vm12 = vmor %vm1602_vm14, %vm1603_vm9 }
 0x237   :  { %1561 = vadd.xlane.f32.xlu2 %v1560_v28  ;;  %v1614_v56 = vmul.f32 128.0, %v1925_v10  ;;  %v1927_v26 = vpop.eup %1926  ;;  %v1599_v28 = vsub.f32 1.0, %v1598_v6  ;;  %vm1618_vm11 = vweird.f32 %v1925_v10 }
 0x238   :  { %vm1647_vm10 = vweird.f32 %v1927_v26 }
 0x274   :  { %v990_v31 = vpop.xlane.xlu1 %989 }
 0x275   :  { %v991_v2 = vrot.slane %v990_v31, 4 }
 0x277   :  { %v992_v29 = vadd.f32 %v991_v2, %v990_v31  ;;  %v1615_v31 = vsub.f32 1.0, %v1614_v56  ;;  %v1643_v2 = vmul.f32 8.0, %v1927_v26 }
 0x279   :  { %v993_v52 = vrot.slane %v992_v29, 2 }
 0x27b   :  { %v994_v35 = vadd.f32 %v993_v52, %v992_v29  ;;  %v1600_v29 = vmul.f32 %v1923_v18, %v1599_v28  ;;  %v1644_v52 = vsub.f32 1.0, %v1643_v2 }
 0x27c   :  { %v1578_v55 = vpop.xlane.xlu1 %1577 }
 0x27d   :  { %v1579_v21 = vrot.slane %v1578_v55, 4  ;;  %v995_v42 = vrot.slane %v994_v35, 1 }
 0x27f   :  { %v1580_v37 = vadd.f32 %v1579_v21, %v1578_v55  ;;  %v996_v3 = vadd.f32 %v995_v42, %v994_v35  ;;  %v1616_v55 = vmul.f32 %v1925_v10, %v1615_v31  ;;  %v1591_v21 = vld [vmem:[#allocation8] sm:$0x1]  ;;  %v1601_v35 = vadd.f32 %v1923_v18, %v1600_v29 }
 0x281   :  { %v1581_v22 = vrot.slane %v1580_v37, 2 }
 0x283   :  { %v1582_v0 = vadd.f32 %v1581_v22, %v1580_v37  ;;  %v1608_v37 = vand.u32 2147483648, %v1592_v47 }
 0x285   :  { %v1583_v53 = vrot.slane %v1582_v0, 1  ;;  %v1609_v42 = vor.u32 1.1754944e-38, %v1608_v37 }
 0x287   :  { %v1584_v5 = vadd.f32 %v1583_v53, %v1582_v0 }
 0x2a2   :  { %v609_v30 = vpop.xlane.xlu2 %608 }
 0x2a3   :  { %v610_v34 = vrot.slane %v609_v30, 4 }
 0x2a5   :  { %v611_v11 = vadd.f32 %v610_v34, %v609_v30 }
 0x2a7   :  { %v612_v23 = vrot.slane %v611_v11, 2 }
 0x2a8   :  { %v1516_v48 = vpop.xlane.xlu0 %1515 }
 0x2a9   :  { %v1517_v20 = vrot.slane %v1516_v48, 4  ;;  %v613_v40 = vadd.f32 %v612_v23, %v611_v11  ;;  %v1606_v11 = vand.u32 2147483647, %v1592_v47 }
 0x2aa   :  { %v1562_v61 = vpop.xlane.xlu2 %1561 }
 0x2ab   :  { %v1518_v7 = vadd.f32 %v1517_v20, %v1516_v48  ;;  %v1563_v59 = vrot.slane %v1562_v61, 4  ;;  %v614_v1 = vrot.slane %v613_v40, 1  ;;  %v1617_v20 = vadd.f32 %v1925_v10, %v1616_v55 }
 0x2ac   :  { %vm1607_vm3 = vcmp.eq.f32.partialorder %v1606_v11, 8.507059e+37 }
 0x2ad   :  { %v1519_v50 = vrot.slane %v1518_v7, 2  ;;  %v1564_v51 = vadd.f32 %v1563_v59, %v1562_v61  ;;  %v615_v36 = vadd.f32 %v614_v1, %v613_v40  ;;  %v1645_v40 = vmul.f32 %v1927_v26, %v1644_v52 }
 0x2ae   :  { %v1605_v59 = vsel %vm3530_vm12, %v1923_v18, %v1601_v35 }
 0x2af   :  { %v1520_v39 = vadd.f32 %v1519_v50, %v1518_v7  ;;  %v1565_v9 = vrot.slane %v1564_v51, 2  ;;  %1769 = vpush %v615_v36  ;;  %v1619_v36 = vsel %vm1618_vm11, %v1925_v10, %v1617_v20  ;;  %v1646_v0 = vadd.f32 %v1927_v26, %v1645_v40 }
 0x2b0   :  { %1771 = vpush %v996_v3 }
 0x2b1   :  { %v1566_v58 = vadd.f32 %v1565_v9, %v1564_v51  ;;  %v1521_v57 = vrot.slane %v1520_v39, 1  ;;  %v1610_v9 = vsel %vm1607_vm3, %v1609_v42, %v1605_v59 }
 0x2b3   :  { %v1522_v54 = vadd.f32 %v1521_v57, %v1520_v39  ;;  %v1567_v43 = vrot.slane %v1566_v58, 1 }
 0x2b5   :  { %1773 = vpush %v1522_v54  ;;  %v1568_v63 = vadd.f32 %v1567_v43, %v1566_v58 }
 0x2b7   :  { %1775 = vpush %v1568_v63 }
 0x2b8   :  { %1777 = vpush %v1584_v5  ;;  %v1648_v5 = vsel %vm1647_vm10, %v1927_v26, %v1646_v0 }
 0x2e0   :  { %s1770_s8 = spop %1769 }
 0x2e1   :  { %v617_v24 = vstv %s1770_s8  ;;  %s1772_s7 = spop %1771 }
 0x2e2   :  { %v618_v33 = vadd.f32 %v617_v24, %v559_v62  ;;  %v998_v19 = vstv %s1772_s7 }
 0x2e3   :  { %v999_v44 = vadd.f32 %v998_v19, %v941_v60 }
 0x2e4   :  { %620 = vst.msk [vmem:[#allocation3] sm:$0x1] %vm57_vm5, %v618_v33 }
 0x2e5   :  { %1000 = vst.msk [vmem:[#allocation4] sm:$0x1] %vm57_vm5, %v999_v44 }
 0x2e6   :  { %s1774_s27 = spop %1773 }
 0x2e7   :  { %v1524_v46 = vstv %s1774_s27 }
 0x2e8   :  { %v1525_v8 = vmul.f32 0.5, %v1524_v46  ;;  %s1776_s28 = spop %1775 }
 0x2e9   :  { %v1570_v41 = vstv %s1776_s28  ;;  %s1778_s29 = spop %1777 }
 0x2ea   :  { %v1526_v27 = vadd.f32 %v1525_v8, %v1466_v4  ;;  %v1571_v16 = vadd.f32 %v1570_v41, %v1557_v38  ;;  %v1586_v13 = vstv %s1778_s29 }
 0x2eb   :  { %v1587_v32 = vadd.f32 %v1586_v13, %v1573_v15  ;;  %v1612_v51 = vld [vmem:[#allocation3] sm:$0x1] }
 0x2ec   :  { %1528 = vst.msk [vmem:[#allocation5] sm:$0x1] %vm57_vm5, %v1526_v27  ;;  %v1620_v57 = vmul.f32 %v1619_v36, %v1612_v51  ;;  %v1641_v63 = vld [vmem:[#allocation4] sm:$0x1] }
 0x2ed   :  { %1572 = vst.msk [vmem:[#allocation7] sm:$0x1] %vm57_vm5, %v1571_v16  ;;  %v1649_v33 = vmul.f32 %v1648_v5, %v1641_v63 }
 0x2ee   :  { %1588 = vst.msk [vmem:[#allocation6] sm:$0x1] %vm57_vm5, %v1587_v32  ;;  %v1650_v19 = vmul.f32 0.5, %v1620_v57 }
 0x2ef   :  { %v1654_v38 = vmul.f32 0.2, %v1649_v33 }
 0x2f3   :  { %v1624_v54 = vld [vmem:[#allocation5] sm:$0x1] }
 0x2f4   :  { %v1594_v34 = vld [vmem:[#allocation7] sm:$0x1] }
 0x2f5   :  { %v1622_v25 = vld [vmem:[#allocation6] sm:$0x1]  ;;  %v1595_v22 = vsub.f32 %v1591_v21, %v1594_v34 }
 0x2f6   :  { %v1623_v45 = vsub.f32 %v1621_v49, %v1622_v25 }
 0x2f7   :  { %v1596_v3 = vsub.f32 0.0, %v1595_v22 }
 0x2f8   :  { %1928 = vrcp.f32 %v1623_v45  ;;  %v1636_v7 = vand.u32 2147483648, %v1623_v45  ;;  %v1634_v50 = vand.u32 2147483647, %v1623_v45  ;;  %vm1630_vm7 = vweird.f32 %v1623_v45 }
 0x2f9   :  { %v1611_v62 = vmul.f32 %v1610_v9, %v1596_v3 }
 0x2fa   :  { %v1637_v58 = vor.u32 1.1754944e-38, %v1636_v7  ;;  %vm1635_vm4 = vcmp.eq.f32.partialorder %v1634_v50, 8.507059e+37 }
 0x2fb   :  { %v1651_v44 = vadd.f32 %v1650_v19, %v1611_v62 }
 0x2fe   :  { %v1929_v30 = vpop.eup %1928 }
 0x2ff   :  { %v1626_v23 = vmul.f32 %v1929_v30, %v1623_v45  ;;  %vm1631_vm0 = vweird.f32 %v1929_v30 }
 0x300   :  { %vm1632_vm13 = vmor %vm1630_vm7, %vm1631_vm0 }
 0x301   :  { %v1627_v61 = vsub.f32 1.0, %v1626_v23 }
 0x303   :  { %v1628_v1 = vmul.f32 %v1929_v30, %v1627_v61 }
 0x305   :  { %v1629_v39 = vadd.f32 %v1929_v30, %v1628_v1 }
 0x307   :  { %v1633_v53 = vsel %vm1632_vm13, %v1929_v30, %v1629_v39 }
 0x308   :  { %v1638_v43 = vsel %vm1635_vm4, %v1637_v58, %v1633_v53 }
 0x309   :  { %v1639_v60 = vmul.f32 %v1638_v43, %v1624_v54 }
 0x30b   :  { %v1640_v24 = vsub.f32 1.0, %v1639_v60 }
 0x30d   :  { %v1652_v4 = vmul.f32 0.3, %v1640_v24 }
 0x30f   :  { %v1653_v46 = vadd.f32 %v1652_v4, %v1651_v44 }
 0x311   :  { %v1655_v47 = vadd.f32 %v1654_v38, %v1653_v46 }
 0x313   :  { %1656 = vst.msk [vmem:[#allocation11] sm:$0x1] %vm57_vm5, %v1655_v47 }
 0x314   :  { %1667 = dma.vmem_to_hbm [thread:$0]  %s1663_s14, 16, %s1665_s16, [#allocation12]  }
 0x315   :  { %1968 = dma.done.wait [#allocation12], 16  }
 0x316   :  { %1969 = vsyncadd [#allocation12], 4294967280 }
 0x317   :  { %1672 = vsyncpa [#allocation12], 1 }

</bundles_post_ra>
